<compile_context>
chip_gen: v7x
topology: tpu7x:2x2x1
jax: 0.10.0
libtpu: 0.0.40
codegen_flags: <defaults>
</compile_context>

<pallas_src>
import functools

import jax
import jax.numpy as jnp
from jax.experimental import pallas as pl
from jax.experimental.pallas import tpu as pltpu

# ----------------------- model dimensions (small, synthetic) -----------------
IMG_DIM = 64
HIDDEN_DIM = 32
Z_DIM = 8
LANES = 128

# bf16 weight-slab row layout (all offsets 16-row aligned for bf16 packing)
ROW_W1E = 0        # 64 rows  (x has 64 lanes)
ROW_W2E = 64       # 128 rows
ROW_WHEAD = 192    # 128 rows (fused mu/sigma head)
ROW_W1D = 320      # 128 rows (w1d duplicated at rows 0:8 and 8:16)
ROW_W2D = 448      # 128 rows
ROW_W3D = 576      # 128 rows
W_ROWS = 704

# f32 bias rows
B1E, B2E, BHEAD, B1D, B2D, B3D = 0, 1, 2, 3, 4, 5
BIAS_ROWS = 8

# fused-head lane layout
SIG_LANE = 0        # sigma pre-activation at head lanes [0, 8)   (aligned with eps)
MU_LANE = 8         # mu                  at head lanes [8, 16)
MU_OUT_LANE = 64    # mu    copy -> output lanes [64, 72)
SIG_OUT_LANE = 72   # sigma copy -> output lanes [72, 80)


def _softplus(x):
    # numerically stable softplus using only exp/log (guaranteed lowerings)
    return jnp.maximum(x, 0.0) + jnp.log(1.0 + jnp.exp(-jnp.abs(x)))


# --------------------------------- kernel ------------------------------------
def vae_kernel(seed_ref, x_ref, eps_ref, w_ref, b_ref, out_ref, *, dropout_p):
    f32 = jnp.float32
    bf16 = jnp.bfloat16
    tb = x_ref.shape[0]

    def wblk(row, nrows):                       # bf16 weight block view
        return w_ref[row:row + nrows, :]

    def brow(k):                                # (1, 128) f32 bias row
        return b_ref[k:k + 1, :]

    def mm(act_f32, row, nrows):                # bf16 x bf16 matmul, f32 accumulate
        return jnp.dot(act_f32.astype(bf16), wblk(row, nrows),
                       preferred_element_type=f32)

    lane = jax.lax.broadcasted_iota(jnp.int32, (tb, LANES), 1)

    if dropout_p > 0.0:                         # static (compile-time) branch
        keep = 1.0 - float(dropout_p)
        thresh = jnp.int32(int(keep * (1 << 24)))
        inv_keep = jnp.float32(1.0 / keep)
        row0 = pl.program_id(0) * tb
        rows = jax.lax.broadcasted_iota(jnp.int32, (tb, LANES), 0) + row0
        base = rows * LANES + lane              # unique counter per element
        seed_mix = seed_ref[0] * jnp.int32(0x61C88647)

        def dropout(v, salt):
            salt_c = jnp.int32((salt * 1013904223) & 0x7FFFFFFF)
            h = base + seed_mix + salt_c
            h = h ^ jax.lax.shift_right_logical(h, 16)
            h = h * jnp.int32(0x7FEB352D)
            h = h ^ jax.lax.shift_right_logical(h, 15)
            h = h * jnp.int32(0x735A2D97)
            h = h ^ jax.lax.shift_right_logical(h, 16)
            u24 = jax.lax.shift_right_logical(h, 8)     # 24 uniform bits, >= 0
            return jnp.where(u24 < thresh, v * inv_keep, 0.0)
    else:
        def dropout(v, salt):
            return v

    # ---------------- Encoder ----------------
    h1 = jnp.maximum(mm(x_ref[...], ROW_W1E, IMG_DIM) + brow(B1E), 0.0)
    h1 = dropout(h1, 1)
    h2 = jnp.maximum(mm(h1, ROW_W2E, LANES) + brow(B2E), 0.0)
    h2 = dropout(h2, 2)
    # fused head: sigma_pre @ lanes 0:8, mu @ 8:16, copies at 64:72 (mu), 72:80 (sigma_pre)
    head = mm(h2, ROW_WHEAD, LANES) + brow(BHEAD)
    sig = 1e-6 + _softplus(head)                # full width; only lanes 0:8 & 72:80 used

    # ---------------- Reparameterization (full-width, no slicing) ----------------
    # eps lives at lanes 0:8 of eps_ref.  v lanes 0:8 = sigma*eps, lanes 8:16 = mu.
    # W1D has w1d at rows 0:8 AND 8:16  =>  v @ W1D == (mu + sigma*eps) @ w1d.
    v = jnp.where(lane < Z_DIM, sig * eps_ref[...], head)

    # ---------------- Decoder ----------------
    d1 = jnp.maximum(mm(v, ROW_W1D, LANES) + brow(B1D), 0.0)
    d1 = dropout(d1, 3)
    d2 = jnp.maximum(mm(d1, ROW_W2D, LANES) + brow(B2D), 0.0)
    d2 = dropout(d2, 4)
    logits = mm(d2, ROW_W3D, LANES) + brow(B3D)
    # sigmoid via exp (EUP) + approximate reciprocal (EUP); clamp to [0, 1]
    xt = jnp.minimum(jnp.maximum(
        pl.reciprocal(1.0 + jnp.exp(-logits), approx=True), 0.0), 1.0)

    # ---- pack one lane-dense 128-wide output tile:  x_target | mu | sigma | 0 ----
    out = jnp.where(lane < MU_OUT_LANE, xt,
                    jnp.where(lane < SIG_OUT_LANE, head,
                              jnp.where(lane < SIG_OUT_LANE + Z_DIM, sig, 0.0)))
    out_ref[...] = out.astype(out_ref.dtype)


# --------------------------------- wrapper -----------------------------------
def vae_forward(x, eps, w_slab, b_slab, *, dropout_p, seed=0, tb=None):
    """x: (B, 64) f32, eps: (B, 8) f32, w_slab: (704, 128) bf16, b_slab: (8, 128) f32.

    NOTE: vary `seed` per training step or dropout masks repeat across calls.
    """
    B = x.shape[0]
    if tb is None:
        tb = 256 if B >= 1024 else 128          # keeps grid >= 2 / even for v7x
    b_pad = ((B + tb - 1) // tb) * tb

    if b_pad != B:
        x = jnp.pad(x, ((0, b_pad - B), (0, 0)))
    # eps -> lane-dense (b_pad, 128) slab with eps at lanes [0, Z_DIM); single pad op.
    eps_slab = jnp.pad(eps, ((0, b_pad - B), (0, LANES - Z_DIM)))
    seed_arr = jnp.asarray([seed], dtype=jnp.int32)

    kernel = functools.partial(vae_kernel, dropout_p=float(dropout_p))
    out = pl.pallas_call(
        kernel,
        out_shape=jax.ShapeDtypeStruct((b_pad, LANES), jnp.float32),
        grid_spec=pltpu.PrefetchScalarGridSpec(
            num_scalar_prefetch=1,
            grid=(b_pad // tb,),
            in_specs=[
                pl.BlockSpec((tb, IMG_DIM), lambda i, s: (i, 0)),       # x  (full 64-lane dim)
                pl.BlockSpec((tb, LANES), lambda i, s: (i, 0)),         # eps slab
                pl.BlockSpec((W_ROWS, LANES), lambda i, s: (0, 0)),     # bf16 weights (resident)
                pl.BlockSpec((BIAS_ROWS, LANES), lambda i, s: (0, 0)),  # f32 biases  (resident)
            ],
            out_specs=pl.BlockSpec((tb, LANES), lambda i, s: (i, 0)),
        ),
        compiler_params=pltpu.CompilerParams(
            dimension_semantics=("parallel",),   # megacore: split batch across TCs
        ),
    )(seed_arr, x, eps_slab, w_slab, b_slab)

    # NOTE: if the downstream loss is also a kernel, consume `out` (packed slab)
    # directly instead of these three slices to avoid the extra HBM round trip.
    x_target = out[:B, 0:IMG_DIM]
    mu = out[:B, MU_OUT_LANE:MU_OUT_LANE + Z_DIM]
    sigma = out[:B, SIG_OUT_LANE:SIG_OUT_LANE + Z_DIM]
    return x_target, mu, sigma


# --------------------------- parameter construction --------------------------
def kaiming(key, fan_in, fan_out):
    # PyTorch kaiming_normal_ on Linear.weight [out, in]: std = sqrt(2 / fan_in).
    # Stored transposed [in, out] so the kernel computes y = x @ W.
    return jax.random.normal(key, (fan_in, fan_out), jnp.float32) * jnp.sqrt(2.0 / fan_in)


def build_raw_params(key):
    ks = jax.random.split(key, 6)
    w3e = kaiming(ks[2], HIDDEN_DIM, 2 * Z_DIM)     # PyTorch out_layer, split into 2 heads
    zeros = lambda n: jnp.zeros((n,), jnp.float32)
    return dict(
        w1e=kaiming(ks[0], IMG_DIM, HIDDEN_DIM), b1e=zeros(HIDDEN_DIM),
        w2e=kaiming(ks[1], HIDDEN_DIM, HIDDEN_DIM), b2e=zeros(HIDDEN_DIM),
        w3e_mu=w3e[:, :Z_DIM], b3e_mu=zeros(Z_DIM),
        w3e_sig=w3e[:, Z_DIM:], b3e_sig=zeros(Z_DIM),
        w1d=kaiming(ks[3], Z_DIM, HIDDEN_DIM), b1d=zeros(HIDDEN_DIM),
        w2d=kaiming(ks[4], HIDDEN_DIM, HIDDEN_DIM), b2d=zeros(HIDDEN_DIM),
        w3d=kaiming(ks[5], HIDDEN_DIM, IMG_DIM), b3d=zeros(IMG_DIM),
    )


def build_param_slabs(p):
    """Pack weights into one (704, 128) bf16 slab and biases into an (8, 128) f32 slab."""
    w = jnp.zeros((W_ROWS, LANES), jnp.float32)
    w = w.at[ROW_W1E:ROW_W1E + IMG_DIM, 0:HIDDEN_DIM].set(p["w1e"])
    w = w.at[ROW_W2E:ROW_W2E + HIDDEN_DIM, 0:HIDDEN_DIM].set(p["w2e"])
    # fused head block
    w = w.at[ROW_WHEAD:ROW_WHEAD + HIDDEN_DIM, SIG_LANE:SIG_LANE + Z_DIM].set(p["w3e_sig"])
    w = w.at[ROW_WHEAD:ROW_WHEAD + HIDDEN_DIM, MU_LANE:MU_LANE + Z_DIM].set(p["w3e_mu"])
    w = w.at[ROW_WHEAD:ROW_WHEAD + HIDDEN_DIM, MU_OUT_LANE:MU_OUT_LANE + Z_DIM].set(p["w3e_mu"])
    w = w.at[ROW_WHEAD:ROW_WHEAD + HIDDEN_DIM, SIG_OUT_LANE:SIG_OUT_LANE + Z_DIM].set(p["w3e_sig"])
    # decoder entry: w1d duplicated for the sigma*eps lanes (0:8) and mu lanes (8:16)
    w = w.at[ROW_W1D + SIG_LANE:ROW_W1D + SIG_LANE + Z_DIM, 0:HIDDEN_DIM].set(p["w1d"])
    w = w.at[ROW_W1D + MU_LANE:ROW_W1D + MU_LANE + Z_DIM, 0:HIDDEN_DIM].set(p["w1d"])
    w = w.at[ROW_W2D:ROW_W2D + HIDDEN_DIM, 0:HIDDEN_DIM].set(p["w2d"])
    w = w.at[ROW_W3D:ROW_W3D + HIDDEN_DIM, 0:IMG_DIM].set(p["w3d"])

    b = jnp.zeros((BIAS_ROWS, LANES), jnp.float32)
    b = b.at[B1E, 0:HIDDEN_DIM].set(p["b1e"])
    b = b.at[B2E, 0:HIDDEN_DIM].set(p["b2e"])
    b = b.at[BHEAD, SIG_LANE:SIG_LANE + Z_DIM].set(p["b3e_sig"])
    b = b.at[BHEAD, MU_LANE:MU_LANE + Z_DIM].set(p["b3e_mu"])
    b = b.at[BHEAD, MU_OUT_LANE:MU_OUT_LANE + Z_DIM].set(p["b3e_mu"])
    b = b.at[BHEAD, SIG_OUT_LANE:SIG_OUT_LANE + Z_DIM].set(p["b3e_sig"])
    b = b.at[B1D, 0:HIDDEN_DIM].set(p["b1d"])
    b = b.at[B2D, 0:HIDDEN_DIM].set(p["b2d"])
    b = b.at[B3D, 0:IMG_DIM].set(p["b3d"])
    return w.astype(jnp.bfloat16), b


# ------------------------------- pure-JAX reference --------------------------
def reference_forward(x, eps, p):
    """VAE forward with dropout disabled, bf16 matmul operands (matches kernel precision)."""
    bf = lambda a: a.astype(jnp.bfloat16)
    mm = lambda a, w: jnp.dot(bf(a), bf(w), preferred_element_type=jnp.float32)
    h = jax.nn.relu(mm(x, p["w1e"]) + p["b1e"])
    h = jax.nn.relu(mm(h, p["w2e"]) + p["b2e"])
    mu = mm(h, p["w3e_mu"]) + p["b3e_mu"]
    sigma = 1e-6 + _softplus(mm(h, p["w3e_sig"]) + p["b3e_sig"])
    z = mu + sigma * eps
    d = jax.nn.relu(mm(z, p["w1d"]) + p["b1d"])
    d = jax.nn.relu(mm(d, p["w2d"]) + p["b2d"])
    xt = jax.nn.sigmoid(mm(d, p["w3d"]) + p["b3d"])
    return xt, mu, sigma


if __name__ == "__main__":
    root = jax.random.PRNGKey(0)
    k_x, k_p, k_eps = jax.random.split(root, 3)

    B = 256
    x = jax.random.normal(k_x, (B, IMG_DIM), jnp.float32)
    eps = jax.random.normal(k_eps, (B, Z_DIM), jnp.float32)
    raw = build_raw_params(k_p)
    w_slab, b_slab = build_param_slabs(raw)

    # 1) Validation pass: dropout disabled -> deterministic, compare vs pure JAX.
    xt0, mu0, sg0 = vae_forward(x, eps, w_slab, b_slab, dropout_p=0.0, seed=0)
    jax.block_until_ready((xt0, mu0, sg0))
    xt_r, mu_r, sg_r = reference_forward(x, eps, raw)
    for got, want, name in ((xt0, xt_r, "x_target"), (mu0, mu_r, "mu"), (sg0, sg_r, "sigma")):
        err = float(jnp.max(jnp.abs(got - want)))
        assert err < 5e-2, f"{name} mismatch vs reference: max|diff|={err}"

    # 2) Training-mode forward (dropout p=0.5, the PyTorch module's default behavior).
    xt, mu, sigma = vae_forward(x, eps, w_slab, b_slab, dropout_p=0.5, seed=1234)
    jax.block_until_ready((xt, mu, sigma))

    assert xt.shape == (B, IMG_DIM)
    assert mu.shape == (B, Z_DIM)
    assert sigma.shape == (B, Z_DIM)
    assert bool(jnp.all(jnp.isfinite(xt)))
    assert bool(jnp.all(jnp.isfinite(mu)))
    assert bool(jnp.all(sigma > 0.0))
    assert bool(jnp.all((xt >= 0.0) & (xt <= 1.0)))

    print("KERNEL_OK")
</pallas_src>

<mosaic_0001>
module attributes {stable_mosaic.version = 11 : i64} {
  func.func @vae_kernel(%arg0: i32, %arg1: memref<1xi32, #tpu.memory_space<smem>>, %arg2: memref<128x64xf32, #tpu.memory_space<vmem>>, %arg3: memref<128x128xf32, #tpu.memory_space<vmem>>, %arg4: memref<704x128xbf16, #tpu.memory_space<vmem>>, %arg5: memref<8x128xf32, #tpu.memory_space<vmem>>, %arg6: memref<128x128xf32, #tpu.memory_space<vmem>>) attributes {dimension_semantics = [#tpu.dimension_semantics<parallel>], iteration_bounds = array<i64: 2>, scalar_prefetch = 1 : i64, scratch_operands = 0 : i64, tpu.core_type = #tpu.core_type<tc>, window_params = [{transform_indices = @transform_0, window_bounds = array<i64: 128, 64>}, {transform_indices = @transform_1, window_bounds = array<i64: 128, 128>}, {pipeline_mode = #tpu.pipeline_mode<synchronous>, transform_indices = @transform_2, window_bounds = array<i64: 704, 128>}, {pipeline_mode = #tpu.pipeline_mode<synchronous>, transform_indices = @transform_3, window_bounds = array<i64: 8, 128>}, {transform_indices = @transform_4, window_bounds = array<i64: 128, 128>}]} {
    %0 = tpu.iota {dimensions = array<i32: 1>} : vector<128x128xi32>
    %c0 = arith.constant 0 : index
    %c0_0 = arith.constant 0 : index
    %1 = vector.load %arg2[%c0, %c0_0] : memref<128x64xf32, #tpu.memory_space<vmem>>, vector<128x64xf32>
    %2 = arith.truncf %1 : vector<128x64xf32> to vector<128x64xbf16>
    %c0_1 = arith.constant 0 : index
    %c0_2 = arith.constant 0 : index
    %3 = vector.load %arg4[%c0_1, %c0_2] : memref<704x128xbf16, #tpu.memory_space<vmem>>, vector<64x128xbf16>
    %cst = arith.constant dense<0.000000e+00> : vector<128x128xf32>
    %4 = tpu.matmul %2, %3, %cst {dimension_numbers = #tpu.dot_dimension_numbers<[1], [0], [0], [1], [0, 0, 1, 1], [], []>} : vector<128x64xbf16>, vector<64x128xbf16>, vector<128x128xf32> -> vector<128x128xf32>
    %c0_3 = arith.constant 0 : index
    %c0_4 = arith.constant 0 : index
    %5 = vector.load %arg5[%c0_3, %c0_4] : memref<8x128xf32, #tpu.memory_space<vmem>>, vector<1x128xf32>
    %6 = vector.broadcast %5 : vector<1x128xf32> to vector<128x128xf32>
    %7 = arith.addf %4, %6 : vector<128x128xf32>
    %cst_5 = arith.constant 0.000000e+00 : f32
    %8 = vector.broadcast %cst_5 : f32 to vector<128x128xf32>
    %9 = arith.maximumf %7, %8 : vector<128x128xf32>
    %10 = arith.truncf %9 : vector<128x128xf32> to vector<128x128xbf16>
    %c64 = arith.constant 64 : index
    %c0_6 = arith.constant 0 : index
    %11 = vector.load %arg4[%c64, %c0_6] : memref<704x128xbf16, #tpu.memory_space<vmem>>, vector<128x128xbf16>
    %cst_7 = arith.constant dense<0.000000e+00> : vector<128x128xf32>
    %12 = tpu.matmul %10, %11, %cst_7 {dimension_numbers = #tpu.dot_dimension_numbers<[1], [0], [0], [1], [0, 0, 1, 1], [], []>} : vector<128x128xbf16>, vector<128x128xbf16>, vector<128x128xf32> -> vector<128x128xf32>
    %c1 = arith.constant 1 : index
    %c0_8 = arith.constant 0 : index
    %13 = vector.load %arg5[%c1, %c0_8] : memref<8x128xf32, #tpu.memory_space<vmem>>, vector<1x128xf32>
    %14 = vector.broadcast %13 : vector<1x128xf32> to vector<128x128xf32>
    %15 = arith.addf %12, %14 : vector<128x128xf32>
    %cst_9 = arith.constant 0.000000e+00 : f32
    %16 = vector.broadcast %cst_9 : f32 to vector<128x128xf32>
    %17 = arith.maximumf %15, %16 : vector<128x128xf32>
    %18 = arith.truncf %17 : vector<128x128xf32> to vector<128x128xbf16>
    %c192 = arith.constant 192 : index
    %c0_10 = arith.constant 0 : index
    %19 = vector.load %arg4[%c192, %c0_10] : memref<704x128xbf16, #tpu.memory_space<vmem>>, vector<128x128xbf16>
    %cst_11 = arith.constant dense<0.000000e+00> : vector<128x128xf32>
    %20 = tpu.matmul %18, %19, %cst_11 {dimension_numbers = #tpu.dot_dimension_numbers<[1], [0], [0], [1], [0, 0, 1, 1], [], []>} : vector<128x128xbf16>, vector<128x128xbf16>, vector<128x128xf32> -> vector<128x128xf32>
    %c2 = arith.constant 2 : index
    %c0_12 = arith.constant 0 : index
    %21 = vector.load %arg5[%c2, %c0_12] : memref<8x128xf32, #tpu.memory_space<vmem>>, vector<1x128xf32>
    %22 = vector.broadcast %21 : vector<1x128xf32> to vector<128x128xf32>
    %23 = arith.addf %20, %22 : vector<128x128xf32>
    %cst_13 = arith.constant 0.000000e+00 : f32
    %24 = vector.broadcast %cst_13 : f32 to vector<128x128xf32>
    %25 = arith.maximumf %23, %24 : vector<128x128xf32>
    %26 = math.absf %23 : vector<128x128xf32>
    %cst_14 = arith.constant 0.000000e+00 : f32
    %27 = vector.broadcast %cst_14 : f32 to vector<128x128xf32>
    %28 = arith.subf %27, %26 : vector<128x128xf32>
    %29 = math.exp %28 : vector<128x128xf32>
    %cst_15 = arith.constant 1.000000e+00 : f32
    %30 = vector.broadcast %cst_15 : f32 to vector<128x128xf32>
    %31 = arith.addf %30, %29 : vector<128x128xf32>
    %32 = math.log %31 : vector<128x128xf32>
    %33 = arith.addf %25, %32 : vector<128x128xf32>
    %cst_16 = arith.constant 9.99999997E-7 : f32
    %34 = vector.broadcast %cst_16 : f32 to vector<128x128xf32>
    %35 = arith.addf %34, %33 : vector<128x128xf32>
    %c8_i32 = arith.constant 8 : i32
    %36 = vector.broadcast %c8_i32 : i32 to vector<128x128xi32>
    %37 = arith.cmpi slt, %0, %36 : vector<128x128xi32>
    %c0_17 = arith.constant 0 : index
    %c0_18 = arith.constant 0 : index
    %38 = vector.load %arg3[%c0_17, %c0_18] : memref<128x128xf32, #tpu.memory_space<vmem>>, vector<128x128xf32>
    %39 = arith.mulf %35, %38 : vector<128x128xf32>
    %40 = arith.select %37, %39, %23 : vector<128x128xi1>, vector<128x128xf32>
    %41 = arith.truncf %40 : vector<128x128xf32> to vector<128x128xbf16>
    %c320 = arith.constant 320 : index
    %c0_19 = arith.constant 0 : index
    %42 = vector.load %arg4[%c320, %c0_19] : memref<704x128xbf16, #tpu.memory_space<vmem>>, vector<128x128xbf16>
    %cst_20 = arith.constant dense<0.000000e+00> : vector<128x128xf32>
    %43 = tpu.matmul %41, %42, %cst_20 {dimension_numbers = #tpu.dot_dimension_numbers<[1], [0], [0], [1], [0, 0, 1, 1], [], []>} : vector<128x128xbf16>, vector<128x128xbf16>, vector<128x128xf32> -> vector<128x128xf32>
    %c3 = arith.constant 3 : index
    %c0_21 = arith.constant 0 : index
    %44 = vector.load %arg5[%c3, %c0_21] : memref<8x128xf32, #tpu.memory_space<vmem>>, vector<1x128xf32>
    %45 = vector.broadcast %44 : vector<1x128xf32> to vector<128x128xf32>
    %46 = arith.addf %43, %45 : vector<128x128xf32>
    %cst_22 = arith.constant 0.000000e+00 : f32
    %47 = vector.broadcast %cst_22 : f32 to vector<128x128xf32>
    %48 = arith.maximumf %46, %47 : vector<128x128xf32>
    %49 = arith.truncf %48 : vector<128x128xf32> to vector<128x128xbf16>
    %c448 = arith.constant 448 : index
    %c0_23 = arith.constant 0 : index
    %50 = vector.load %arg4[%c448, %c0_23] : memref<704x128xbf16, #tpu.memory_space<vmem>>, vector<128x128xbf16>
    %cst_24 = arith.constant dense<0.000000e+00> : vector<128x128xf32>
    %51 = tpu.matmul %49, %50, %cst_24 {dimension_numbers = #tpu.dot_dimension_numbers<[1], [0], [0], [1], [0, 0, 1, 1], [], []>} : vector<128x128xbf16>, vector<128x128xbf16>, vector<128x128xf32> -> vector<128x128xf32>
    %c4 = arith.constant 4 : index
    %c0_25 = arith.constant 0 : index
    %52 = vector.load %arg5[%c4, %c0_25] : memref<8x128xf32, #tpu.memory_space<vmem>>, vector<1x128xf32>
    %53 = vector.broadcast %52 : vector<1x128xf32> to vector<128x128xf32>
    %54 = arith.addf %51, %53 : vector<128x128xf32>
    %cst_26 = arith.constant 0.000000e+00 : f32
    %55 = vector.broadcast %cst_26 : f32 to vector<128x128xf32>
    %56 = arith.maximumf %54, %55 : vector<128x128xf32>
    %57 = arith.truncf %56 : vector<128x128xf32> to vector<128x128xbf16>
    %c576 = arith.constant 576 : index
    %c0_27 = arith.constant 0 : index
    %58 = vector.load %arg4[%c576, %c0_27] : memref<704x128xbf16, #tpu.memory_space<vmem>>, vector<128x128xbf16>
    %cst_28 = arith.constant dense<0.000000e+00> : vector<128x128xf32>
    %59 = tpu.matmul %57, %58, %cst_28 {dimension_numbers = #tpu.dot_dimension_numbers<[1], [0], [0], [1], [0, 0, 1, 1], [], []>} : vector<128x128xbf16>, vector<128x128xbf16>, vector<128x128xf32> -> vector<128x128xf32>
    %c5 = arith.constant 5 : index
    %c0_29 = arith.constant 0 : index
    %60 = vector.load %arg5[%c5, %c0_29] : memref<8x128xf32, #tpu.memory_space<vmem>>, vector<1x128xf32>
    %61 = vector.broadcast %60 : vector<1x128xf32> to vector<128x128xf32>
    %62 = arith.addf %59, %61 : vector<128x128xf32>
    %cst_30 = arith.constant 0.000000e+00 : f32
    %63 = vector.broadcast %cst_30 : f32 to vector<128x128xf32>
    %64 = arith.subf %63, %62 : vector<128x128xf32>
    %65 = math.exp %64 : vector<128x128xf32>
    %cst_31 = arith.constant 1.000000e+00 : f32
    %66 = vector.broadcast %cst_31 : f32 to vector<128x128xf32>
    %67 = arith.addf %66, %65 : vector<128x128xf32>
    %68 = tpu.reciprocal %67 {approx = true} : vector<128x128xf32> -> vector<128x128xf32>
    %cst_32 = arith.constant 0.000000e+00 : f32
    %69 = vector.broadcast %cst_32 : f32 to vector<128x128xf32>
    %70 = arith.maximumf %68, %69 : vector<128x128xf32>
    %cst_33 = arith.constant 1.000000e+00 : f32
    %71 = vector.broadcast %cst_33 : f32 to vector<128x128xf32>
    %72 = arith.minimumf %70, %71 : vector<128x128xf32>
    %c64_i32 = arith.constant 64 : i32
    %73 = vector.broadcast %c64_i32 : i32 to vector<128x128xi32>
    %74 = arith.cmpi slt, %0, %73 : vector<128x128xi32>
    %c72_i32 = arith.constant 72 : i32
    %75 = vector.broadcast %c72_i32 : i32 to vector<128x128xi32>
    %76 = arith.cmpi slt, %0, %75 : vector<128x128xi32>
    %c80_i32 = arith.constant 80 : i32
    %77 = vector.broadcast %c80_i32 : i32 to vector<128x128xi32>
    %78 = arith.cmpi slt, %0, %77 : vector<128x128xi32>
    %cst_34 = arith.constant 0.000000e+00 : f32
    %79 = vector.broadcast %cst_34 : f32 to vector<128x128xf32>
    %80 = arith.select %78, %35, %79 : vector<128x128xi1>, vector<128x128xf32>
    %81 = arith.select %76, %23, %80 : vector<128x128xi1>, vector<128x128xf32>
    %82 = arith.select %74, %72, %81 : vector<128x128xi1>, vector<128x128xf32>
    %c0_35 = arith.constant 0 : index
    %c0_36 = arith.constant 0 : index
    %83 = vector.load %arg6[%c0_35, %c0_36] : memref<128x128xf32, #tpu.memory_space<vmem>>, vector<128x128xf32>
    tpu.vector_store %arg6[%c0_35, %c0_36], %82 {strides = array<i32>} : memref<128x128xf32, #tpu.memory_space<vmem>>, vector<128x128xf32>,
    return
  }
  func.func @transform_0(%arg0: i32, %arg1: memref<1xi32, #tpu.memory_space<smem>>) -> (i32, i32) {
    %c0_i32 = arith.constant 0 : i32
    %c0_i32_0 = arith.constant 0 : i32
    return %arg0, %c0_i32 : i32, i32
  }
  func.func @transform_1(%arg0: i32, %arg1: memref<1xi32, #tpu.memory_space<smem>>) -> (i32, i32) {
    %c0_i32 = arith.constant 0 : i32
    %c0_i32_0 = arith.constant 0 : i32
    return %arg0, %c0_i32 : i32, i32
  }
  func.func @transform_2(%arg0: i32, %arg1: memref<1xi32, #tpu.memory_space<smem>>) -> (i32, i32) {
    %c0_i32 = arith.constant 0 : i32
    %c0_i32_0 = arith.constant 0 : i32
    %c0_i32_1 = arith.constant 0 : i32
    return %c0_i32, %c0_i32_0 : i32, i32
  }
  func.func @transform_3(%arg0: i32, %arg1: memref<1xi32, #tpu.memory_space<smem>>) -> (i32, i32) {
    %c0_i32 = arith.constant 0 : i32
    %c0_i32_0 = arith.constant 0 : i32
    %c0_i32_1 = arith.constant 0 : i32
    return %c0_i32, %c0_i32_0 : i32, i32
  }
  func.func @transform_4(%arg0: i32, %arg1: memref<1xi32, #tpu.memory_space<smem>>) -> (i32, i32) {
    %c0_i32 = arith.constant 0 : i32
    %c0_i32_0 = arith.constant 0 : i32
    return %arg0, %c0_i32 : i32, i32
  }
}

</mosaic_0001>

<bundles_post_ra>
// kernel: tpu_custom_call.1
= control target key start
LH: loop header
LB: loop body
LE: loop exit
PB: predicated region body
PF: predicated region fallthrough
CT: control target
= control target key end

     0   :  { %11 = vsyncpa [#allocation5], 0  ;;  %s3335_s0 = inlined_call_operand.<no memory space> [shape: s32[1], index: 0, kind: input, shape index: {}]   ;;  %s3336_s1 = inlined_call_operand.vmem [shape: f32[256,64], index: 1, kind: input, shape index: {}]   ;;  %s3337_s2 = inlined_call_operand.hbm [shape: f32[256,128], index: 2, kind: input, shape index: {}]   ;;  %s3338_s3 = inlined_call_operand.vmem [shape: bf16[704,128], index: 3, kind: input, shape index: {}]   ;;  %s3339_s4 = inlined_call_operand.vmem [shape: f32[8,128], index: 4, kind: input, shape index: {}]   ;;  %s3340_s5 = inlined_call_operand.hbm [shape: f32[256,128], index: 5, kind: output, shape index: {}]  }
   0x1   :  { %13 = vsyncpa [#allocation5 + $0x1], 0 }
   0x2   :  { %14 = vsyncpa [#allocation6], 0 }
   0x3   :  { %16 = vsyncpa [#allocation6 + $0x1], 0  ;;  %s2573_s0 = smov 0   ;;  %s2575_s18 = smov 0  }
   0x4   :  { %s2577_s19 = smov 0   ;;  %s2579_s20 = smov 0  }
   0x5 LB: > { %s2594_s21 = sadd.s32 4294967295, %s2535_s20   ;;  %s1849_s22 = sadd.s32 4294967294, %s2535_s20   ;;  %s2535_s20 = sphi %s2579_s20, %s3353_s20   ;;  %s2531_s19 = sphi %s2577_s19, %s3352_s19   ;;  %s2527_s18 = sphi %s2575_s18, %s3351_s18   ;;  %s2523_s0 = sphi %s2573_s0, %s3350_s0  }
   0x6   : > { %s2598_s23 = sadd.s32 1, %s2535_s20   ;;  %s55_s24 = sadd.s32 1, %s2531_s19 }
   0x7   : > { %s52_s25 = ssub.s32 %s2535_s20, %s2598_s23  ;;  %p62_p0 = scmp.ne.s32.totalorder %s2531_s19, %s2527_s18 }
   0x8   : > { %p53_p1 = scmp.eq.s32.totalorder %s52_s25, 0  ;;  %p63_p2 = scmp.eq.s32.totalorder %s2535_s20, 0 }
   0x9   : > { %p68_p3 = scmp.ne.s32.totalorder %s2527_s18, %s2523_s0  ;;  %p69_p4 = scmp.eq.s32.totalorder %s2594_s21, 0 }
   0xa   : > { %s2610_s26 = scalar_select %p53_p1, %s2531_s19, %s55_s24  }
   0xb   : > { %p2612_p5 = por %p63_p2, %p62_p0  ;;  %p2616_p6 = por %p69_p4, %p68_p3 }
   0xc   : > { %p134_p7 = scmp.eq.s32.totalorder %s2594_s21, 1  ;;  %p140_p8 = scmp.eq.s32.totalorder %s1849_s22, 1 }
   0xd   : > { %p2229_p10 = scmp.lt.s32.totalorder %s2535_s20, 2  ;;  %s175_s6 = sand.u32 1, %s2531_s19  }
   0xe   : > { %p2623_p11 = por %p134_p7, %p62_p0  ;;  %p2627_p12 = por %p140_p8, %p68_p3 }
   0xf   : > { %s1923_s7 = sshll.u32 %s2535_s20, 11  ;;  %s1852_s8 = sshll.u32 %s175_s6, 7 }
  0x10   : > { %s3344_s29 = scalar_select %p2623_p11, 1, 0 }
  0x11   : > { %s3345_s30 = scalar_select %p2627_p12, 1, 0 }
  0x12   : > { %s2636_s11 = scalar_lea.hbm %s3337_s2, %s1923_s7  ;;  %s179_s12 = scalar_lea.vmem [#allocation4], %s1852_s8 }
  0x13   : > { %s186_s13 = sshll.u32 %s179_s12, 4  ;;  %p2640_p13 = pnand %p2229_p10, %p2612_p5  ;;  %s2644_s13 = int_to_ptr.vmem [resolvable:$true] %s186_s13 }
  0x14   : > { %s2646_s15 = scalar_lea.sflag [#allocation5], %s175_s6  ;;  %s2439_s16 = scalar_lea.hbm %s2636_s11, 2048 }
  0x15   : > { %p2440_p0 = scmp.ne.s32.totalorder %s2636_s11, %s2439_s16  ;;  %p2441_p1 = pneg %p2640_p13 }
  0x16   : > { %s2444_s24 = scalar_lea.hbm %s3337_s2, 4096  ;;  %p2445_p4 = scmp.lt.u32.totalorder %s2636_s11, %s3337_s2 }
  0x17   : > { %p2442_p2 = pnand %p2441_p1, %p2440_p0  ;;  %p2446_p5 = scmp.lt.u32.totalorder %s2444_s24, %s2439_s16 }
  0x18   : > { %p2448_p8 = scmp.lt.u32.totalorder %s2439_s16, %s2636_s11 }
  0x19   : > { %p2443_p3 = pneg %p2442_p2  ;;  %p2447_p7 = por %p2446_p5, %p2445_p4 }
  0x1b   : > { %p2449_p10 = por %p2448_p8, %p2447_p7 }
  0x1d   : > { %p2450_p9 = pnand %p2449_p10, %p2443_p3 }
  0x1f   : > { %2453 = shalt.err (!%p2450_p9)
}
  0x20   : > { %s2454_s6 = scalar_lea.vmem %s2644_s13, 2048  ;;  %s2537_s7 = smov [#allocation4]  }
  0x21   : > { %p2455_p0 = scmp.ne.s32.totalorder %s2644_s13, %s2454_s6  ;;  %s2459_s8 = sshll.u32 %s2537_s7, 4  ;;  %s2460_s8 = int_to_ptr.vmem [resolvable:$false] %s2459_s8 }
  0x22   : > { %s2461_s9 = scalar_lea.vmem %s2460_s8, 4096  ;;  %p2462_p11 = scmp.lt.s32.totalorder %s2644_s13, %s2460_s8 }
  0x23   : > { %p2457_p2 = pnand %p2455_p0, %p2441_p1  ;;  %p2463_p4 = scmp.lt.s32.totalorder %s2461_s9, %s2454_s6 }
  0x25   : > { %p2458_p12 = pneg %p2457_p2  ;;  %p2464_p5 = por %p2463_p4, %p2462_p11 }
  0x27   : > { %p2465_p7 = pnand %p2464_p5, %p2458_p12 }
  0x29   : > { %2468 = shalt.err (!%p2465_p7)
}
  0x2a   : > { %s2538_s10 = smov 128   ;;  %s2539_s12 = smov 8  }
  0x2b   : > { %2224 = dma.hbm_to_vmem [thread:$0]  (!%p2640_p13), %s2636_s11, 2048, %s2644_s13, %s2646_s15, %s2538_s10, %s2538_s10, %s2539_s12  }
  0x2c   : > { %p1855_p9 = scmp.ge.s32.totalorder %s2535_s20, 1  ;;  %p194_p1 = scmp.lt.s32.totalorder %s2535_s20, 3 }
  0x2e   : > { %p195_p3 = pnand %p1855_p9, %p194_p1 }
  0x2f   : > { %s2677_s16 = sand.u32 (!%p195_p3), 1, %s2527_s18  }
  0x30   : > { %198 = sbr.rel (%p195_p3) target bundleno = 1518 (0x5ee), region = 36  ;;  %s1856_s17 = sshll.u32 (!%p195_p3), %s2677_s16, 7 }
  0x31   : > { %s201_s22 = scalar_lea.sflag (!%p195_p3), [#allocation5], %s2677_s16  ;;  %s2683_s24 = scalar_lea.vmem (!%p195_p3), [#allocation4], %s1856_s17 }
  0x37   : > { %2514 = dma.done.wait (%p2616_p6), %s201_s22, 2048  }
  0x38   : > { %2516 = vsyncadd (%p2616_p6), %s201_s22, 4294965248  ;;  %s1858_s11 = sshll.u32 %s2594_s21, 4  ;;  %v2267_v0 = vld [vmem:[%s3338_s3] sm:$0xff]   ;;  %v2268_v1 = vld [vmem:[%s3338_s3 + $0x8] sm:$0xff]   ;;  %vm306_vm0 = vcmask 523264   ;;  %s3221_s27 = scalar_lea.vmem [#allocation7], %s1856_s17 }
  0x39   : > { %p235_p11 = scmp.lt.s32.totalorder %s1858_s11, 31  ;;  %2017 = vmatprep.subr.bf16.mxu0 %v2267_v0  ;;  %v2269_v2 = vld [vmem:[%s3338_s3 + $0x10] sm:$0xff]   ;;  %v2270_v6 = vld [vmem:[%s3338_s3 + $0x18] sm:$0xff]   ;;  %v2271_v10 = vld [vmem:[%s3338_s3 + $0x20] sm:$0xff]   ;;  %s1924_s17 = sshll.u32 %s2594_s21, 11 }
  0x3a   : > { %2018 = vmatpush3.bf16.msra.mxu0 %v2267_v0  ;;  %v2272_v11 = vld [vmem:[%s3338_s3 + $0x28] sm:$0xff]   ;;  %2041 = vmatprep.subr.bf16.mxu1 %v2271_v10  ;;  %v2273_v14 = vld [vmem:[%s3338_s3 + $0x30] sm:$0xff]   ;;  %v2274_v16 = vld [vmem:[%s3338_s3 + $0x38] sm:$0xff]   ;;  %s1764_s6 = sshll.u32 %s3221_s27, 4  ;;  %s3280_s21 = scalar_lea.hbm %s3340_s5, %s1924_s17  ;;  %s3282_s6 = int_to_ptr.vmem [resolvable:$true] %s1764_s6 }
  0x3b   : > { %s3355_s11 = smov (!%p235_p11, %s1858_s11), 31  ;;  %2019 = vmatprep.subr.bf16.mxu0 %v2268_v1  ;;  %2042 = vmatpush3.bf16.msra.mxu1 %v2271_v10  ;;  %v2275_v21 = vld [vmem:[%s3338_s3 + $0x40] sm:$0xff]   ;;  %v2276_v24 = vld [vmem:[%s3338_s3 + $0x48] sm:$0xff]   ;;  %v2277_v34 = vld [vmem:[%s3338_s3 + $0x50] sm:$0xff]   ;;  %s2469_s9 = scalar_lea.vmem %s3282_s6, 2048 }
  0x3c   : > { %s1859_s13 = sshll.u32 %s3355_s11, 3  ;;  %2043 = vmatprep.subr.bf16.mxu1 %v2272_v11  ;;  %v2278_v35 = vld [vmem:[%s3338_s3 + $0x58] sm:$0xff]   ;;  %v2279_v36 = vld [vmem:[%s3338_s3 + $0x60] sm:$0xff]   ;;  %v2280_v37 = vld [vmem:[%s3338_s3 + $0x68] sm:$0xff]   ;;  %p2470_p6 = scmp.ne.s32.totalorder %s3282_s6, %s2469_s9 }
  0x3d   : > { %s2699_s8 = scalar_lea.vmem %s3336_s1, %s1859_s13  ;;  %v2281_v38 = vld [vmem:[%s3338_s3 + $0x70] sm:$0xff]   ;;  %v2282_v39 = vld [vmem:[%s3338_s3 + $0x78] sm:$0xff]   ;;  %v2283_v40 = vld [vmem:[%s3338_s3 + $0x80] sm:$0xff]   ;;  %p3347_p12 = scmp.ne.s32.totalorder %s3344_s29, 0 }
  0x3e   : > { %v245_v3 = vld [vmem:[%s2699_s8] sm:$0xff]  ;;  %v246_v4 = vld [vmem:[%s2699_s8 + $0x8] sm:$0xff]  ;;  %2020 = vmatpush3.bf16.msra.mxu0 %v2268_v1  ;;  %v247_v7 = vld [vmem:[%s2699_s8 + $0x10] sm:$0xff]  ;;  %s2540_s10 = smov [#allocation7]  }
  0x3f   : > { %v261_v5 = vpack.c.bf16 %v246_v4, %v245_v3  ;;  %2021 = vmatprep.subr.bf16.mxu0 %v2269_v2  ;;  %v248_v8 = vld [vmem:[%s2699_s8 + $0x18] sm:$0xff]  ;;  %v249_v9 = vld [vmem:[%s2699_s8 + $0x20] sm:$0xff]  ;;  %v250_v12 = vld [vmem:[%s2699_s8 + $0x28] sm:$0xff]  ;;  %2044 = vmatpush3.bf16.msra.mxu1 %v2272_v11  ;;  %p2471_p13 = pnand %p2470_p6, %p3347_p12  ;;  %s2473_s12 = sshll.u32 %s2540_s10, 4  ;;  %s2474_s12 = int_to_ptr.vmem [resolvable:$false] %s2473_s12 }
  0x40   : > { %v262_v13 = vpack.c.bf16 %v248_v8, %v247_v7  ;;  %v263_v15 = vpack.c.bf16 %v250_v12, %v249_v9  ;;  %v251_v17 = vld [vmem:[%s2699_s8 + $0x30] sm:$0xff]  ;;  %v252_v18 = vld [vmem:[%s2699_s8 + $0x38] sm:$0xff]  ;;  %v253_v19 = vld [vmem:[%s2699_s8 + $0x40] sm:$0xff]  ;;  %2045 = vmatprep.subr.bf16.mxu1 %v2273_v14  ;;  %s2475_s22 = scalar_lea.vmem %s2474_s12, 4096  ;;  %p2476_p10 = scmp.lt.s32.totalorder %s3282_s6, %s2474_s12 }
  0x41   : > { %2025 = vmatprep.mubr.msk.bf16.mxu0 %vm306_vm0, %v261_v5  ;;  %v254_v20 = vld [vmem:[%s2699_s8 + $0x48] sm:$0xff]  ;;  %v264_v22 = vpack.c.bf16 %v252_v18, %v251_v17  ;;  %v255_v25 = vld [vmem:[%s2699_s8 + $0x50] sm:$0xff]  ;;  %v256_v26 = vld [vmem:[%s2699_s8 + $0x58] sm:$0xff]  ;;  %p2472_p8 = pneg %p2471_p13  ;;  %p2477_p0 = scmp.lt.s32.totalorder %s2475_s22, %s2469_s9 }
  0x42   : > { %2022 = vmatpush3.bf16.msra.mxu0 %v2269_v2  ;;  %v265_v23 = vpack.c.bf16 %v254_v20, %v253_v19  ;;  %v257_v27 = vld [vmem:[%s2699_s8 + $0x60] sm:$0xff]  ;;  %v258_v28 = vld [vmem:[%s2699_s8 + $0x68] sm:$0xff]  ;;  %v266_v29 = vpack.c.bf16 %v256_v26, %v255_v25  ;;  %v259_v31 = vld [vmem:[%s2699_s8 + $0x70] sm:$0xff] }
  0x43   : > { %2023 = vmatprep.subr.bf16.mxu0 %v2270_v6  ;;  %2046 = vmatpush3.bf16.msra.mxu1 %v2273_v14  ;;  %v267_v30 = vpack.c.bf16 %v258_v28, %v257_v27  ;;  %v260_v32 = vld [vmem:[%s2699_s8 + $0x78] sm:$0xff]  ;;  %v2284_v41 = vld [vmem:[%s3338_s3 + $0x88] sm:$0xff]   ;;  %v1860_v42 = vld [vmem:[%s3339_s4] ss:$0 sm:$0xff]  ;;  %p2478_p2 = por %p2477_p0, %p2476_p10 }
  0x44   : > { %2047 = vmatprep.subr.bf16.mxu1 %v2274_v16  ;;  %v268_v33 = vpack.c.bf16 %v260_v32, %v259_v31 }
  0x45   : > { %p2479_p4 = pnand %p2478_p2, %p2472_p8 }
  0x46   : > { %2024 = vmatpush3.bf16.msra.mxu0 %v2270_v6 }
  0x47   : > { %2048 = vmatpush3.bf16.msra.mxu1 %v2274_v16  ;;  %2073 = vmatprep.subr.bf16.mxu0 %v2279_v36 }
  0x48   : > { %2049 = vmatprep.subr.bf16.mxu1 %v2275_v21 }
  0x49   : > { %2026 = vmatmul.mubr.msk.bf16.vlgmr.msra.gmra.mrb[0].mxu0 %vm306_vm0, %v262_v13 }
  0x4a   : > { %2029 = vmatprep.mubr.msk.bf16.mxu0 %vm306_vm0, %v263_v15  ;;  %2074 = vmatpush3.bf16.msra.mxu0 %v2279_v36  ;;  %v2286_v36 = vld [vmem:[%s3338_s3 + $0x98] sm:$0xff]  }
  0x4b   : > { %2050 = vmatpush3.bf16.msra.mxu1 %v2275_v21  ;;  %2075 = vmatprep.subr.bf16.mxu0 %v2280_v37 }
  0x4c   : > { %2051 = vmatprep.subr.bf16.mxu1 %v2276_v24 }
  0x4e   : > { %2076 = vmatpush3.bf16.msra.mxu0 %v2280_v37  ;;  %v1873_v37 = vld [vmem:[%s3339_s4 + $0x1] ss:$0 sm:$0xff] }
  0x4f   : > { %2052 = vmatpush3.bf16.msra.mxu1 %v2276_v24  ;;  %2077 = vmatprep.subr.bf16.mxu0 %v2281_v38 }
  0x50   : > { %2053 = vmatprep.subr.bf16.mxu1 %v2277_v34 }
  0x51   : > { %2030 = vmatmul.mubr.msk.bf16.gmra.mrb[4].mxu0 %vm306_vm0, %v264_v22 }
  0x52   : > { %2033 = vmatprep.mubr.msk.bf16.mxu0 %vm306_vm0, %v265_v23  ;;  %2078 = vmatpush3.bf16.msra.mxu0 %v2281_v38 }
  0x53   : > { %2054 = vmatpush3.bf16.msra.mxu1 %v2277_v34  ;;  %2079 = vmatprep.subr.bf16.mxu0 %v2282_v39 }
  0x54   : > { %2055 = vmatprep.subr.bf16.mxu1 %v2278_v35 }
  0x56   : > { %2080 = vmatpush3.bf16.msra.mxu0 %v2282_v39 }
  0x57   : > { %2056 = vmatpush3.bf16.msra.mxu1 %v2278_v35  ;;  %2081 = vmatprep.subr.bf16.mxu0 %v2283_v40  ;;  %v2285_v35 = vld [vmem:[%s3338_s3 + $0x90] sm:$0xff]  }
  0x59   : > { %2034 = vmatmul.mubr.msk.bf16.gmra.mrb[8].mxu0 %vm306_vm0, %v266_v29 }
  0x5a   : > { %2037 = vmatprep.mubr.msk.bf16.mxu0 %vm306_vm0, %v267_v30  ;;  %2082 = vmatpush3.bf16.msra.mxu0 %v2283_v40 }
  0x5b   : > { %2083 = vmatprep.subr.bf16.mxu0 %v2284_v41 }
  0x5e   : > { %2084 = vmatpush3.bf16.msra.mxu0 %v2284_v41 }
  0x5f   : > { %2085 = vmatprep.subr.bf16.mxu0 %v2285_v35 }
  0x61   : > { %2038 = vmatmul.mubr.msk.bf16.gmra.mrb[12].mxu0 %vm306_vm0, %v268_v33 }
  0x62   : > { %2086 = vmatpush3.bf16.msra.mxu0 %v2285_v35  ;;  %v2292_v35 = vld [vmem:[%s3338_s3 + $0xc8] sm:$0xff]  }
  0x63   : > { %2087 = vmatprep.subr.bf16.mxu0 %v2286_v36 }
  0x66   : > { %2088 = vmatpush3.bf16.msra.mxu0 %v2286_v36  ;;  %v2293_v36 = vld [vmem:[%s3338_s3 + $0xd0] sm:$0xff]  }
 0x11c   : > { %v2027_v43 = vpop.f32.mrb[0].mxu0 }
 0x11d   : > { %v374_v44 = vadd.f32 %v2027_v43, %v1860_v42  ;;  %v365_v45 = vpop.f32.mrb[1].mxu0 }
 0x11e   : > { %v366_v46 = vadd.f32 %v1860_v42, %v365_v45  ;;  %v2028_v47 = vpop.f32.mrb[2].mxu0 }
 0x11f   : > { %v377_v48 = vadd.f32 %v2028_v47, %v1860_v42  ;;  %v368_v49 = vpop.f32.mrb[3].mxu0  ;;  %v430_v51 = vmax.f32 %v374_v44, 0.0 }
 0x120   : > { %v369_v50 = vadd.f32 %v1860_v42, %v368_v49  ;;  %v428_v53 = vmax.f32 %v366_v46, 0.0 }
 0x121   : > { %v431_v52 = vmax.f32 %v377_v48, 0.0 }
 0x122   : > { %v429_v54 = vmax.f32 %v369_v50, 0.0 }
 0x123   : > { %v445_v55 = vpack.c.bf16 %v431_v52, %v430_v51 }
 0x124   : > { %v2031_v56 = vpop.f32.mrb[4].mxu0  ;;  %v444_v57 = vpack.c.bf16 %v429_v54, %v428_v53 }
 0x125   : > { %v390_v58 = vadd.f32 %v2031_v56, %v1860_v42  ;;  %v381_v59 = vpop.f32.mrb[5].mxu0 }
 0x126   : > { %v382_v60 = vadd.f32 %v1860_v42, %v381_v59  ;;  %v2032_v61 = vpop.f32.mrb[6].mxu0  ;;  %2057 = vmatprep.mubr.bf16.mxu1 %v444_v57 }
 0x127   : > { %v393_v62 = vadd.f32 %v2032_v61, %v1860_v42  ;;  %v384_v63 = vpop.f32.mrb[7].mxu0  ;;  %2058 = vmatmul.mubr.bf16.vlgmr.msra.gmra.mrb[0].mxu1 %v445_v55  ;;  %v434_v1 = vmax.f32 %v390_v58, 0.0 }
 0x128   : > { %v385_v0 = vadd.f32 %v1860_v42, %v384_v63  ;;  %v432_v3 = vmax.f32 %v382_v60, 0.0 }
 0x129   : > { %v435_v2 = vmax.f32 %v393_v62, 0.0 }
 0x12a   : > { %v433_v4 = vmax.f32 %v385_v0, 0.0 }
 0x12b   : > { %v447_v5 = vpack.c.bf16 %v435_v2, %v434_v1 }
 0x12c   : > { %v446_v6 = vpack.c.bf16 %v433_v4, %v432_v3  ;;  %v2035_v7 = vpop.f32.mrb[8].mxu0 }
 0x12d   : > { %v406_v8 = vadd.f32 %v2035_v7, %v1860_v42  ;;  %v397_v9 = vpop.f32.mrb[9].mxu0 }
 0x12e   : > { %v398_v10 = vadd.f32 %v1860_v42, %v397_v9  ;;  %v2036_v11 = vpop.f32.mrb[10].mxu0  ;;  %2061 = vmatprep.mubr.bf16.mxu1 %v446_v6 }
 0x12f   : > { %v409_v12 = vadd.f32 %v2036_v11, %v1860_v42  ;;  %v400_v13 = vpop.f32.mrb[11].mxu0  ;;  %2062 = vmatmul.mubr.bf16.gmra.mrb[4].mxu1 %v447_v5  ;;  %v438_v15 = vmax.f32 %v406_v8, 0.0 }
 0x130   : > { %v401_v14 = vadd.f32 %v1860_v42, %v400_v13  ;;  %v436_v17 = vmax.f32 %v398_v10, 0.0 }
 0x131   : > { %v439_v16 = vmax.f32 %v409_v12, 0.0 }
 0x132   : > { %v437_v18 = vmax.f32 %v401_v14, 0.0 }
 0x133   : > { %v449_v19 = vpack.c.bf16 %v439_v16, %v438_v15 }
 0x134   : > { %v448_v20 = vpack.c.bf16 %v437_v18, %v436_v17  ;;  %v2039_v21 = vpop.f32.mrb[12].mxu0 }
 0x135   : > { %v422_v22 = vadd.f32 %v2039_v21, %v1860_v42  ;;  %v413_v23 = vpop.f32.mrb[13].mxu0 }
 0x136   : > { %v414_v24 = vadd.f32 %v1860_v42, %v413_v23  ;;  %v2040_v25 = vpop.f32.mrb[14].mxu0  ;;  %2065 = vmatprep.mubr.bf16.mxu1 %v448_v20 }
 0x137   : > { %v425_v26 = vadd.f32 %v2040_v25, %v1860_v42  ;;  %v416_v27 = vpop.f32.mrb[15].mxu0  ;;  %2066 = vmatmul.mubr.bf16.gmra.mrb[8].mxu1 %v449_v19  ;;  %v442_v29 = vmax.f32 %v422_v22, 0.0 }
 0x138   : > { %v417_v28 = vadd.f32 %v1860_v42, %v416_v27  ;;  %v440_v31 = vmax.f32 %v414_v24, 0.0 }
 0x139   : > { %v443_v30 = vmax.f32 %v425_v26, 0.0 }
 0x13a   : > { %v441_v32 = vmax.f32 %v417_v28, 0.0 }
 0x13b   : > { %v451_v33 = vpack.c.bf16 %v443_v30, %v442_v29  ;;  %v2287_v30 = vld [vmem:[%s3338_s3 + $0xa0] sm:$0xff]  }
 0x13c   : > { %v450_v34 = vpack.c.bf16 %v441_v32, %v440_v31  ;;  %2105 = vmatprep.subr.bf16.mxu1 %v2287_v30  ;;  %v2288_v31 = vld [vmem:[%s3338_s3 + $0xa8] sm:$0xff]   ;;  %v2289_v32 = vld [vmem:[%s3338_s3 + $0xb0] sm:$0xff]  }
 0x13d   : > { %2106 = vmatpush3.bf16.msra.mxu1 %v2287_v30 }
 0x13e   : > { %2069 = vmatprep.mubr.bf16.mxu1 %v450_v34  ;;  %2107 = vmatprep.subr.bf16.mxu1 %v2288_v31  ;;  %v2291_v34 = vld [vmem:[%s3338_s3 + $0xc0] sm:$0xff]  }
 0x13f   : > { %2070 = vmatmul.mubr.bf16.gmra.mrb[12].mxu1 %v451_v33  ;;  %v2290_v33 = vld [vmem:[%s3338_s3 + $0xb8] sm:$0xff]  }
 0x141   : > { %2108 = vmatpush3.bf16.msra.mxu1 %v2288_v31 }
 0x142   : > { %2109 = vmatprep.subr.bf16.mxu1 %v2289_v32 }
 0x145   : > { %2110 = vmatpush3.bf16.msra.mxu1 %v2289_v32 }
 0x146   : > { %2111 = vmatprep.subr.bf16.mxu1 %v2290_v33 }
 0x149   : > { %2112 = vmatpush3.bf16.msra.mxu1 %v2290_v33 }
 0x14a   : > { %2113 = vmatprep.subr.bf16.mxu1 %v2291_v34 }
 0x14d   : > { %2114 = vmatpush3.bf16.msra.mxu1 %v2291_v34 }
 0x14e   : > { %2115 = vmatprep.subr.bf16.mxu1 %v2292_v35 }
 0x151   : > { %2116 = vmatpush3.bf16.msra.mxu1 %v2292_v35 }
 0x152   : > { %2117 = vmatprep.subr.bf16.mxu1 %v2293_v36 }
 0x155   : > { %2118 = vmatpush3.bf16.msra.mxu1 %v2293_v36 }
 0x1fa   : > { %v2059_v38 = vpop.f32.mrb[0].mxu1 }
 0x1fb   : > { %v564_v39 = vadd.f32 %v2059_v38, %v1873_v37  ;;  %v555_v40 = vpop.f32.mrb[1].mxu1  ;;  %v2295_v38 = vld [vmem:[%s3338_s3 + $0xe0] sm:$0xff]  }
 0x1fc   : > { %v556_v41 = vadd.f32 %v1873_v37, %v555_v40  ;;  %v2060_v42 = vpop.f32.mrb[2].mxu1  ;;  %2137 = vmatprep.subr.bf16.mxu0 %v2295_v38  ;;  %v2297_v40 = vld [vmem:[%s3338_s3 + $0xf0] sm:$0xff]  }
 0x1fd   : > { %v567_v43 = vadd.f32 %v2060_v42, %v1873_v37  ;;  %v558_v44 = vpop.f32.mrb[3].mxu1  ;;  %v620_v46 = vmax.f32 %v564_v39, 0.0  ;;  %v2296_v39 = vld [vmem:[%s3338_s3 + $0xe8] sm:$0xff]   ;;  %v2299_v42 = vld [vmem:[%s3338_s3 + $0x100] sm:$0xff]  }
 0x1fe   : > { %v559_v45 = vadd.f32 %v1873_v37, %v558_v44  ;;  %v618_v48 = vmax.f32 %v556_v41, 0.0  ;;  %v2298_v41 = vld [vmem:[%s3338_s3 + $0xf8] sm:$0xff]   ;;  %v2830_v44 = vld [vmem:[%s3339_s4 + $0x2] ss:$0 sm:$0xff] }
 0x1ff   : > { %v621_v47 = vmax.f32 %v567_v43, 0.0  ;;  %v2300_v43 = vld [vmem:[%s3338_s3 + $0x108] sm:$0xff]  }
 0x200   : > { %v619_v49 = vmax.f32 %v559_v45, 0.0 }
 0x201   : > { %v635_v50 = vpack.c.bf16 %v621_v47, %v620_v46 }
 0x202   : > { %v634_v51 = vpack.c.bf16 %v619_v49, %v618_v48  ;;  %v2063_v52 = vpop.f32.mrb[4].mxu1 }
 0x203   : > { %v580_v53 = vadd.f32 %v2063_v52, %v1873_v37  ;;  %v571_v54 = vpop.f32.mrb[5].mxu1 }
 0x204   : > { %v572_v55 = vadd.f32 %v1873_v37, %v571_v54  ;;  %v2064_v56 = vpop.f32.mrb[6].mxu1  ;;  %2089 = vmatprep.mubr.bf16.mxu0 %v634_v51 }
 0x205   : > { %v583_v57 = vadd.f32 %v2064_v56, %v1873_v37  ;;  %v574_v58 = vpop.f32.mrb[7].mxu1  ;;  %2090 = vmatmul.mubr.bf16.vlgmr.msra.gmra.mrb[16].mxu0 %v635_v50  ;;  %v624_v60 = vmax.f32 %v580_v53, 0.0 }
 0x206   : > { %v575_v59 = vadd.f32 %v1873_v37, %v574_v58  ;;  %v622_v62 = vmax.f32 %v572_v55, 0.0  ;;  %2138 = vmatpush3.bf16.msra.mxu0 %v2295_v38 }
 0x207   : > { %v625_v61 = vmax.f32 %v583_v57, 0.0  ;;  %2139 = vmatprep.subr.bf16.mxu0 %v2296_v39 }
 0x208   : > { %v623_v63 = vmax.f32 %v575_v59, 0.0 }
 0x209   : > { %v637_v0 = vpack.c.bf16 %v625_v61, %v624_v60 }
 0x20a   : > { %v636_v1 = vpack.c.bf16 %v623_v63, %v622_v62  ;;  %v2067_v2 = vpop.f32.mrb[8].mxu1  ;;  %2140 = vmatpush3.bf16.msra.mxu0 %v2296_v39 }
 0x20b   : > { %v596_v3 = vadd.f32 %v2067_v2, %v1873_v37  ;;  %v587_v4 = vpop.f32.mrb[9].mxu1  ;;  %2141 = vmatprep.subr.bf16.mxu0 %v2297_v40 }
 0x20c   : > { %v588_v5 = vadd.f32 %v1873_v37, %v587_v4  ;;  %v2068_v6 = vpop.f32.mrb[10].mxu1  ;;  %2093 = vmatprep.mubr.bf16.mxu0 %v636_v1 }
 0x20d   : > { %v599_v7 = vadd.f32 %v2068_v6, %v1873_v37  ;;  %v590_v8 = vpop.f32.mrb[11].mxu1  ;;  %2094 = vmatmul.mubr.bf16.gmra.mrb[20].mxu0 %v637_v0  ;;  %v628_v10 = vmax.f32 %v596_v3, 0.0 }
 0x20e   : > { %v591_v9 = vadd.f32 %v1873_v37, %v590_v8  ;;  %v626_v12 = vmax.f32 %v588_v5, 0.0  ;;  %2142 = vmatpush3.bf16.msra.mxu0 %v2297_v40 }
 0x20f   : > { %v629_v11 = vmax.f32 %v599_v7, 0.0  ;;  %2143 = vmatprep.subr.bf16.mxu0 %v2298_v41 }
 0x210   : > { %v627_v13 = vmax.f32 %v591_v9, 0.0 }
 0x211   : > { %v639_v14 = vpack.c.bf16 %v629_v11, %v628_v10 }
 0x212   : > { %v638_v15 = vpack.c.bf16 %v627_v13, %v626_v12  ;;  %v2071_v16 = vpop.f32.mrb[12].mxu1  ;;  %2144 = vmatpush3.bf16.msra.mxu0 %v2298_v41 }
 0x213   : > { %v612_v17 = vadd.f32 %v2071_v16, %v1873_v37  ;;  %v603_v18 = vpop.f32.mrb[13].mxu1  ;;  %2145 = vmatprep.subr.bf16.mxu0 %v2299_v42 }
 0x214   : > { %v604_v19 = vadd.f32 %v1873_v37, %v603_v18  ;;  %v2072_v20 = vpop.f32.mrb[14].mxu1  ;;  %2097 = vmatprep.mubr.bf16.mxu0 %v638_v15 }
 0x215   : > { %v615_v21 = vadd.f32 %v2072_v20, %v1873_v37  ;;  %v606_v22 = vpop.f32.mrb[15].mxu1  ;;  %2098 = vmatmul.mubr.bf16.gmra.mrb[24].mxu0 %v639_v14  ;;  %v632_v24 = vmax.f32 %v612_v17, 0.0  ;;  %v243_v17 = vlaneseq }
 0x216   : > { %v607_v23 = vadd.f32 %v1873_v37, %v606_v22  ;;  %v630_v26 = vmax.f32 %v604_v19, 0.0  ;;  %v2294_v37 = vld [vmem:[%s3338_s3 + $0xd8] sm:$0xff]   ;;  %2146 = vmatpush3.bf16.msra.mxu0 %v2299_v42 }
 0x217   : > { %v633_v25 = vmax.f32 %v615_v21, 0.0  ;;  %2119 = vmatprep.subr.bf16.mxu1 %v2294_v37  ;;  %2147 = vmatprep.subr.bf16.mxu0 %v2300_v43  ;;  %v2874_v32 = vand.u32 127, %v243_v17 }
 0x218   : > { %v631_v27 = vmax.f32 %v607_v23, 0.0  ;;  %2120 = vmatpush3.bf16.msra.mxu1 %v2294_v37 }
 0x219   : > { %v641_v28 = vpack.c.bf16 %v633_v25, %v632_v24  ;;  %vm1685_vm1 = vcmp.lt.s32.totalorder %v2874_v32, 80  ;;  %vm1684_vm2 = vcmp.lt.s32.totalorder %v2874_v32, 72  ;;  %vm968_vm3 = vcmp.lt.s32.totalorder %v2874_v32, 8 }
 0x21a   : > { %v640_v29 = vpack.c.bf16 %v631_v27, %v630_v26  ;;  %2148 = vmatpush3.bf16.msra.mxu0 %v2300_v43  ;;  %vm1683_vm4 = vcmp.lt.s32.totalorder %v2874_v32, 64 }
 0x21c   : > { %2101 = vmatprep.mubr.bf16.mxu0 %v640_v29 }
 0x21d   : > { %2102 = vmatmul.mubr.bf16.gmra.mrb[28].mxu0 %v641_v28 }
 0x2d8   : > { %v2091_v45 = vpop.f32.mrb[16].mxu0 }
 0x2d9   : > { %v2833_v46 = vadd.f32 %v2091_v45, %v2830_v44  ;;  %v745_v47 = vpop.f32.mrb[17].mxu0 }
 0x2da   : > { %v2836_v48 = vadd.f32 %v2830_v44, %v745_v47  ;;  %v2092_v49 = vpop.f32.mrb[18].mxu0 }
 0x2db   : > { %v826_v50 = vand.u32 2147483647, %v2833_v46  ;;  %v2840_v51 = vadd.f32 %v2092_v49, %v2830_v44  ;;  %v748_v52 = vpop.f32.mrb[19].mxu0  ;;  %v810_v36 = vmax.f32 %v2833_v46, 0.0 }
 0x2dc   : > { %v824_v53 = vand.u32 2147483647, %v2836_v48  ;;  %v2844_v54 = vadd.f32 %v2830_v44, %v748_v52 }
 0x2dd   : > { %v842_v55 = vsub.f32 0.0, %v826_v50  ;;  %v827_v56 = vand.u32 2147483647, %v2840_v51  ;;  %v808_v50 = vmax.f32 %v2836_v48, 0.0 }
 0x2de   : > { %v840_v57 = vsub.f32 0.0, %v824_v53  ;;  %v825_v58 = vand.u32 2147483647, %v2844_v54 }
 0x2df   : > { %v860_v59 = vmul.f32 1.442695, %v842_v55  ;;  %v843_v60 = vsub.f32 0.0, %v827_v56  ;;  %v811_v56 = vmax.f32 %v2840_v51, 0.0 }
 0x2e0   : > { %v856_v61 = vmul.f32 1.442695, %v840_v57  ;;  %v841_v62 = vsub.f32 0.0, %v825_v58  ;;  %v2095_v63 = vpop.f32.mrb[20].mxu0 }
 0x2e1   : > { %2311 = vpow2.f32 %v860_v59  ;;  %v862_v0 = vmul.f32 1.442695, %v843_v60  ;;  %v2849_v1 = vadd.f32 %v2095_v63, %v2830_v44  ;;  %v761_v2 = vpop.f32.mrb[21].mxu0  ;;  %v809_v60 = vmax.f32 %v2844_v54, 0.0 }
 0x2e2   : > { %2313 = vpow2.f32 %v856_v61  ;;  %v858_v3 = vmul.f32 1.442695, %v841_v62  ;;  %v2852_v4 = vadd.f32 %v2830_v44, %v761_v2  ;;  %v2096_v5 = vpop.f32.mrb[22].mxu0 }
 0x2e3   : > { %2315 = vpow2.f32 %v862_v0  ;;  %v830_v6 = vand.u32 2147483647, %v2849_v1  ;;  %v2856_v7 = vadd.f32 %v2096_v5, %v2830_v44  ;;  %v764_v8 = vpop.f32.mrb[23].mxu0  ;;  %v814_v2 = vmax.f32 %v2849_v1, 0.0 }
 0x2e4   : > { %2317 = vpow2.f32 %v858_v3  ;;  %v828_v9 = vand.u32 2147483647, %v2852_v4  ;;  %v2860_v10 = vadd.f32 %v2830_v44, %v764_v8 }
 0x2e5   : > { %v846_v11 = vsub.f32 0.0, %v830_v6  ;;  %v831_v12 = vand.u32 2147483647, %v2856_v7 }
 0x2e6   : > { %v844_v13 = vsub.f32 0.0, %v828_v9  ;;  %v829_v14 = vand.u32 2147483647, %v2860_v10 }
 0x2e7   : > { %v868_v15 = vmul.f32 1.442695, %v846_v11  ;;  %v847_v16 = vsub.f32 0.0, %v831_v12  ;;  %v812_v11 = vmax.f32 %v2852_v4, 0.0  ;;  %v815_v12 = vmax.f32 %v2856_v7, 0.0 }
 0x2e8   : > { %v864_v18 = vmul.f32 1.442695, %v844_v13  ;;  %v845_v19 = vsub.f32 0.0, %v829_v14  ;;  %v2099_v20 = vpop.f32.mrb[24].mxu0 }
 0x2e9   : > { %2319 = vpow2.f32 %v868_v15  ;;  %v870_v21 = vmul.f32 1.442695, %v847_v16  ;;  %v2865_v22 = vadd.f32 %v2099_v20, %v2830_v44  ;;  %v777_v23 = vpop.f32.mrb[25].mxu0 }
 0x2ea   : > { %2321 = vpow2.f32 %v864_v18  ;;  %v866_v24 = vmul.f32 1.442695, %v845_v19  ;;  %v2868_v25 = vadd.f32 %v2830_v44, %v777_v23  ;;  %v2100_v26 = vpop.f32.mrb[26].mxu0 }
 0x2eb   : > { %v2312_v27 = vpop.eup %2311  ;;  %2323 = vpow2.f32 %v870_v21  ;;  %v834_v28 = vand.u32 2147483647, %v2865_v22  ;;  %v2872_v29 = vadd.f32 %v2100_v26, %v2830_v44  ;;  %v780_v30 = vpop.f32.mrb[27].mxu0 }
 0x2ec   : > { %v2314_v31 = vpop.eup %2313  ;;  %v890_v33 = vadd.f32 1.0, %v2312_v27  ;;  %2325 = vpow2.f32 %v866_v24  ;;  %v832_v34 = vand.u32 2147483647, %v2868_v25  ;;  %v2880_v43 = vadd.f32 %v2830_v44, %v780_v30 }
 0x2ed   : > { %v2316_v35 = vpop.eup %2315  ;;  %v888_v37 = vadd.f32 1.0, %v2314_v31  ;;  %v850_v38 = vsub.f32 0.0, %v834_v28  ;;  %v835_v39 = vand.u32 2147483647, %v2872_v29  ;;  %v813_v28 = vmax.f32 %v2860_v10, 0.0 }
 0x2ee   : > { %v2318_v40 = vpop.eup %2317  ;;  %2327 = vlog2.f32 %v890_v33  ;;  %v891_v41 = vadd.f32 1.0, %v2316_v35  ;;  %v848_v42 = vsub.f32 0.0, %v832_v34  ;;  %v833_v53 = vand.u32 2147483647, %v2880_v43 }
 0x2ef   : > { %2329 = vlog2.f32 %v888_v37  ;;  %v889_v45 = vadd.f32 1.0, %v2318_v40  ;;  %v876_v47 = vmul.f32 1.442695, %v850_v38  ;;  %v851_v49 = vsub.f32 0.0, %v835_v39 }
 0x2f0   : > { %2331 = vlog2.f32 %v891_v41  ;;  %v872_v52 = vmul.f32 1.442695, %v848_v42  ;;  %v2103_v55 = vpop.f32.mrb[28].mxu0  ;;  %v849_v61 = vsub.f32 0.0, %v833_v53  ;;  %v818_v35 = vmax.f32 %v2865_v22, 0.0 }
 0x2f1   : > { %2333 = vlog2.f32 %v889_v45  ;;  %v878_v57 = vmul.f32 1.442695, %v851_v49  ;;  %v2886_v58 = vadd.f32 %v2103_v55, %v2830_v44  ;;  %v793_v59 = vpop.f32.mrb[29].mxu0 }
 0x2f2   : > { %2335 = vpow2.f32 %v876_v47  ;;  %v2890_v62 = vadd.f32 %v2830_v44, %v793_v59  ;;  %v2104_v63 = vpop.f32.mrb[30].mxu0  ;;  %v874_v15 = vmul.f32 1.442695, %v849_v61  ;;  %v816_v47 = vmax.f32 %v2868_v25, 0.0 }
 0x2f3   : > { %v2320_v0 = vpop.eup %2319  ;;  %2337 = vpow2.f32 %v872_v52  ;;  %v838_v3 = vand.u32 2147483647, %v2886_v58  ;;  %v2895_v5 = vadd.f32 %v2104_v63, %v2830_v44  ;;  %v796_v6 = vpop.f32.mrb[31].mxu0  ;;  %v971_v52 = vld [vmem:[%s2683_s24 + $0x10] sm:$0xff] }
 0x2f4   : > { %v2322_v8 = vpop.eup %2321  ;;  %v894_v9 = vadd.f32 1.0, %v2320_v0  ;;  %2339 = vpow2.f32 %v878_v57  ;;  %v836_v17 = vand.u32 2147483647, %v2890_v62  ;;  %v2905_v21 = vadd.f32 %v2830_v44, %v796_v6  ;;  %v972_v6 = vld [vmem:[%s2683_s24 + $0x18] sm:$0xff] }
 0x2f5   : > { %v2324_v13 = vpop.eup %2323  ;;  %v892_v14 = vadd.f32 1.0, %v2322_v8  ;;  %v854_v16 = vsub.f32 0.0, %v838_v3  ;;  %v839_v20 = vand.u32 2147483647, %v2895_v5 }
 0x2f6   : > { %v2326_v18 = vpop.eup %2325  ;;  %2341 = vlog2.f32 %v894_v9  ;;  %v895_v19 = vadd.f32 1.0, %v2324_v13  ;;  %v852_v26 = vsub.f32 0.0, %v836_v17  ;;  %v837_v31 = vand.u32 2147483647, %v2905_v21 }
 0x2f7   : > { %2343 = vlog2.f32 %v892_v14  ;;  %v893_v23 = vadd.f32 1.0, %v2326_v18  ;;  %v884_v24 = vmul.f32 1.442695, %v854_v16  ;;  %v855_v30 = vsub.f32 0.0, %v839_v20 }
 0x2f8   : > { %v2328_v27 = vpop.eup %2327  ;;  %2345 = vlog2.f32 %v895_v19  ;;  %v880_v37 = vmul.f32 1.442695, %v852_v26  ;;  %v853_v40 = vsub.f32 0.0, %v837_v31  ;;  %v969_v31 = vld [vmem:[%s2683_s24] sm:$0xff] }
 0x2f9   : > { %v2330_v33 = vpop.eup %2329  ;;  %v909_v34 = vmul.f32 0.6931472, %v2328_v27  ;;  %2347 = vlog2.f32 %v893_v23  ;;  %v886_v39 = vmul.f32 1.442695, %v855_v30 }
 0x2fa   : > { %v2332_v44 = vpop.eup %2331  ;;  %v905_v38 = vmul.f32 0.6931472, %v2330_v33  ;;  %2349 = vpow2.f32 %v874_v15  ;;  %v882_v57 = vmul.f32 1.442695, %v853_v40 }
 0x2fb   : > { %v2334_v41 = vpop.eup %2333  ;;  %v938_v42 = vadd.f32 %v909_v34, %v810_v36  ;;  %v911_v45 = vmul.f32 0.6931472, %v2332_v44  ;;  %2351 = vpow2.f32 %v884_v24 }
 0x2fc   : > { %v2336_v49 = vpop.eup %2335  ;;  %v936_v53 = vadd.f32 %v905_v38, %v808_v50  ;;  %v907_v55 = vmul.f32 0.6931472, %v2334_v41  ;;  %2353 = vpow2.f32 %v880_v37 }
 0x2fd   : > { %v2338_v59 = vpop.eup %2337  ;;  %v954_v61 = vadd.f32 1e-06, %v938_v42  ;;  %v939_v63 = vadd.f32 %v911_v45, %v811_v56  ;;  %v898_v0 = vadd.f32 1.0, %v2336_v49  ;;  %2355 = vpow2.f32 %v886_v39 }
 0x2fe   : > { %v2340_v36 = vpop.eup %2339  ;;  %v952_v3 = vadd.f32 1e-06, %v936_v53  ;;  %v937_v8 = vadd.f32 %v907_v55, %v809_v60  ;;  %v896_v9 = vadd.f32 1.0, %v2338_v59  ;;  %2357 = vpow2.f32 %v882_v57 }
 0x2ff   : > { %v987_v13 = vmul.f32 %v971_v52, %v954_v61  ;;  %v1688_v50 = vsel %vm1685_vm1, %v954_v61, 0.0  ;;  %v955_v14 = vadd.f32 1e-06, %v939_v63  ;;  %2359 = vlog2.f32 %v898_v0 }
 0x300   : > { %v2342_v15 = vpop.eup %2341  ;;  %v2926_v56 = vsel %vm1684_vm2, %v2833_v46, %v1688_v50  ;;  %v1686_v16 = vsel %vm1685_vm1, %v952_v3, 0.0  ;;  %v953_v17 = vadd.f32 1e-06, %v937_v8  ;;  %2361 = vlog2.f32 %v896_v9 }
 0x301   : > { %v2344_v60 = vpop.eup %2343  ;;  %v2933_v18 = vsel %vm968_vm3, %v987_v13, %v2833_v46  ;;  %v2938_v19 = vsel %vm1684_vm2, %v2836_v48, %v1686_v16  ;;  %v988_v20 = vmul.f32 %v972_v6, %v955_v14  ;;  %v1689_v23 = vsel %vm1685_vm1, %v955_v14, 0.0 }
 0x302   : > { %v2346_v24 = vpop.eup %2345  ;;  %v2945_v26 = vsel %vm1684_vm2, %v2840_v51, %v1689_v23  ;;  %v1687_v46 = vsel %vm1685_vm1, %v953_v17, 0.0  ;;  %v917_v27 = vmul.f32 0.6931472, %v2342_v15  ;;  %v913_v30 = vmul.f32 0.6931472, %v2344_v60  ;;  %v973_v15 = vld [vmem:[%s2683_s24 + $0x20] sm:$0xff] }
 0x303   : > { %v2348_v33 = vpop.eup %2347  ;;  %v2953_v34 = vsel %vm968_vm3, %v988_v20, %v2840_v51  ;;  %v2958_v37 = vsel %vm1684_vm2, %v2844_v54, %v1687_v46  ;;  %v919_v44 = vmul.f32 0.6931472, %v2346_v24  ;;  %v899_v38 = vadd.f32 1.0, %v2340_v36  ;;  %v970_v51 = vld [vmem:[%s2683_s24 + $0x8] sm:$0xff] }
 0x304   : > { %v2350_v39 = vpop.eup %2349  ;;  %v1018_v40 = vpack.c.bf16 %v2953_v34, %v2933_v18  ;;  %v942_v41 = vadd.f32 %v917_v27, %v814_v2  ;;  %v940_v42 = vadd.f32 %v913_v30, %v812_v11  ;;  %v915_v45 = vmul.f32 0.6931472, %v2348_v33  ;;  %v974_v24 = vld [vmem:[%s2683_s24 + $0x28] sm:$0xff]  ;;  %v975_v33 = vld [vmem:[%s2683_s24 + $0x30] sm:$0xff] }
 0x305   : > { %v2352_v49 = vpop.eup %2351  ;;  %v943_v52 = vadd.f32 %v919_v44, %v815_v12  ;;  %2363 = vlog2.f32 %v899_v38  ;;  %v897_v53 = vadd.f32 1.0, %v2350_v39  ;;  %v985_v55 = vmul.f32 %v969_v31, %v952_v3  ;;  %v976_v44 = vld [vmem:[%s2683_s24 + $0x38] sm:$0xff] }
 0x306   : > { %v2354_v57 = vpop.eup %2353  ;;  %v958_v59 = vadd.f32 1e-06, %v942_v41  ;;  %v956_v61 = vadd.f32 1e-06, %v940_v42  ;;  %v941_v63 = vadd.f32 %v915_v45, %v813_v28  ;;  %v902_v0 = vadd.f32 1.0, %v2352_v49 }
 0x307   : > { %v2356_v2 = vpop.eup %2355  ;;  %v959_v36 = vadd.f32 1e-06, %v943_v52  ;;  %2365 = vlog2.f32 %v897_v53  ;;  %v900_v11 = vadd.f32 1.0, %v2354_v57  ;;  %v986_v6 = vmul.f32 %v970_v51, %v953_v17 }
 0x308   : > { %v2358_v8 = vpop.eup %2357  ;;  %v1692_v12 = vsel %vm1685_vm1, %v958_v59, 0.0  ;;  %v1690_v3 = vsel %vm1685_vm1, %v956_v61, 0.0  ;;  %v957_v9 = vadd.f32 1e-06, %v941_v63  ;;  %2367 = vlog2.f32 %v902_v0 }
 0x309   : > { %v2360_v13 = vpop.eup %2359  ;;  %v2978_v28 = vsel %vm1684_vm2, %v2849_v1, %v1692_v12  ;;  %v2983_v50 = vsel %vm1684_vm2, %v2852_v4, %v1690_v3  ;;  %v1693_v14 = vsel %vm1685_vm1, %v959_v36, 0.0  ;;  %2369 = vlog2.f32 %v900_v11 }
 0x30a   : > { %v2362_v16 = vpop.eup %2361  ;;  %v2991_v17 = vsel %vm1684_vm2, %v2856_v7, %v1693_v14  ;;  %v1691_v60 = vsel %vm1685_vm1, %v957_v9, 0.0  ;;  %v925_v20 = vmul.f32 0.6931472, %v2360_v13  ;;  %v903_v23 = vadd.f32 1.0, %v2356_v2  ;;  %v980_v14 = vld [vmem:[%s2683_s24 + $0x58] sm:$0xff] }
 0x30b   : > { %v2999_v46 = vsel %vm1684_vm2, %v2860_v10, %v1691_v60  ;;  %v921_v27 = vmul.f32 0.6931472, %v2362_v16  ;;  %v901_v30 = vadd.f32 1.0, %v2358_v8  ;;  %v1001_v31 = vsel %vm968_vm3, %v985_v55, %v2836_v48  ;;  %v977_v55 = vld [vmem:[%s2683_s24 + $0x40] sm:$0xff] }
 0x30c   : > { %v946_v38 = vadd.f32 %v925_v20, %v818_v35  ;;  %2371 = vlog2.f32 %v903_v23  ;;  %v1002_v39 = vsel %vm968_vm3, %v986_v6, %v2844_v54  ;;  %v989_v41 = vmul.f32 %v973_v15, %v956_v61 }
 0x30d   : > { %v944_v42 = vadd.f32 %v921_v27, %v816_v47  ;;  %2373 = vlog2.f32 %v901_v30  ;;  %v1017_v45 = vpack.c.bf16 %v1002_v39, %v1001_v31  ;;  %v990_v51 = vmul.f32 %v974_v24, %v957_v9  ;;  %v978_v30 = vld [vmem:[%s2683_s24 + $0x48] sm:$0xff] }
 0x30e   : > { %v962_v49 = vadd.f32 1e-06, %v946_v38  ;;  %v819_v48 = vmax.f32 %v2872_v29, 0.0  ;;  %v991_v52 = vmul.f32 %v975_v33, %v958_v59  ;;  %v992_v53 = vmul.f32 %v976_v44, %v959_v36  ;;  %v979_v36 = vld [vmem:[%s2683_s24 + $0x50] sm:$0xff] }
 0x30f   : > { %v2364_v35 = vpop.eup %2363  ;;  %v960_v57 = vadd.f32 1e-06, %v944_v42  ;;  %v817_v63 = vmax.f32 %v2880_v43, 0.0  ;;  %2121 = vmatprep.mubr.bf16.mxu1 %v1017_v45  ;;  %v1005_v54 = vsel %vm968_vm3, %v989_v41, %v2852_v4  ;;  %v1006_v47 = vsel %vm968_vm3, %v990_v51, %v2860_v10 }
 0x310   : > { %v1696_v61 = vsel %vm1685_vm1, %v962_v49, 0.0  ;;  %v927_v0 = vmul.f32 0.6931472, %v2364_v35  ;;  %2122 = vmatmul.mubr.bf16.vlgmr.msra.gmra.mrb[16].mxu1 %v1018_v40  ;;  %v1019_v59 = vpack.c.bf16 %v1006_v47, %v1005_v54  ;;  %v1007_v2 = vsel %vm968_vm3, %v991_v52, %v2849_v1  ;;  %v981_v54 = vld [vmem:[%s2683_s24 + $0x60] sm:$0xff]  ;;  %v983_v47 = vld [vmem:[%s2683_s24 + $0x70] sm:$0xff] }
 0x311   : > { %v2366_v4 = vpop.eup %2365  ;;  %v3034_v10 = vsel %vm1684_vm2, %v2865_v22, %v1696_v61  ;;  %v1694_v11 = vsel %vm1685_vm1, %v960_v57, 0.0  ;;  %v1008_v18 = vsel %vm968_vm3, %v992_v53, %v2856_v7  ;;  %v993_v34 = vmul.f32 %v977_v55, %v960_v57 }
 0x312   : > { %v2368_v40 = vpop.eup %2367  ;;  %v3044_v1 = vsel %vm1684_vm2, %v2868_v25, %v1694_v11  ;;  %v947_v6 = vadd.f32 %v927_v0, %v819_v48  ;;  %v923_v8 = vmul.f32 0.6931472, %v2366_v4  ;;  %2125 = vmatprep.mubr.bf16.mxu1 %v1019_v59  ;;  %v1020_v12 = vpack.c.bf16 %v1008_v18, %v1007_v2 }
 0x313   : > { %v2370_v3 = vpop.eup %2369  ;;  %v822_v9 = vmax.f32 %v2886_v58, 0.0  ;;  %v933_v13 = vmul.f32 0.6931472, %v2368_v40  ;;  %v995_v15 = vmul.f32 %v979_v36, %v962_v49  ;;  %v820_v60 = vmax.f32 %v2890_v62, 0.0  ;;  %v984_v36 = vld [vmem:[%s2683_s24 + $0x78] sm:$0xff] }
 0x314   : > { %v963_v16 = vadd.f32 1e-06, %v947_v6  ;;  %v945_v7 = vadd.f32 %v923_v8, %v817_v63  ;;  %v929_v20 = vmul.f32 0.6931472, %v2370_v3  ;;  %v823_v24 = vmax.f32 %v2895_v5, 0.0 }
 0x315   : > { %v950_v23 = vadd.f32 %v933_v13, %v822_v9  ;;  %v821_v27 = vmax.f32 %v2905_v21, 0.0  ;;  %v1009_v31 = vsel %vm968_vm3, %v993_v34, %v2868_v25  ;;  %v1011_v25 = vsel %vm968_vm3, %v995_v15, %v2865_v22  ;;  %v982_v34 = vld [vmem:[%s2683_s24 + $0x68] sm:$0xff]  ;;  %s1751_s24 = scalar_lea.sflag [#allocation6], %s2677_s16 }
 0x316   : > { %v2372_v33 = vpop.eup %2371  ;;  %v1697_v44 = vsel %vm1685_vm1, %v963_v16, 0.0  ;;  %v961_v38 = vadd.f32 1e-06, %v945_v7  ;;  %v948_v39 = vadd.f32 %v929_v20, %v820_v60  ;;  %v996_v41 = vmul.f32 %v980_v14, %v963_v16 }
 0x317   : > { %v2374_v42 = vpop.eup %2373  ;;  %v3060_v45 = vsel %vm1684_vm2, %v2872_v29, %v1697_v44  ;;  %v966_v51 = vadd.f32 1e-06, %v950_v23  ;;  %v935_v49 = vmul.f32 0.6931472, %v2372_v33  ;;  %v3161_v33 = vld [vmem:[%s3339_s4 + $0x3] ss:$0 sm:$0xff] }
 0x318   : > { %v1695_v48 = vsel %vm1685_vm1, %v961_v38, 0.0  ;;  %v964_v52 = vadd.f32 1e-06, %v948_v39  ;;  %v931_v53 = vmul.f32 0.6931472, %v2374_v42  ;;  %2126 = vmatmul.mubr.bf16.gmra.mrb[20].mxu1 %v1020_v12  ;;  %v994_v55 = vmul.f32 %v978_v30, %v961_v38  ;;  %v3146_v30 = vld [vmem:[%s3338_s3 + $0x140] sm:$0xff]  }
 0x319   : > { %v3070_v35 = vsel %vm1684_vm2, %v2880_v43, %v1695_v48  ;;  %v1700_v57 = vsel %vm1685_vm1, %v966_v51, 0.0  ;;  %v951_v63 = vadd.f32 %v935_v49, %v823_v24  ;;  %v1012_v22 = vsel %vm968_vm3, %v996_v41, %v2872_v29  ;;  %v2305_v24 = vld [vmem:[%s3338_s3 + $0x130] sm:$0xff]  }
 0x31a   : > { %v3082_v61 = vsel %vm1684_vm2, %v2886_v58, %v1700_v57  ;;  %v1698_v0 = vsel %vm1685_vm1, %v964_v52, 0.0  ;;  %v949_v59 = vadd.f32 %v931_v53, %v821_v27  ;;  %v1010_v2 = vsel %vm968_vm3, %v994_v55, %v2880_v43  ;;  %v3140_v27 = vld [vmem:[%s3338_s3 + $0x138] sm:$0xff]  }
 0x31b   : > { %v3093_v29 = vsel %vm1684_vm2, %v2890_v62, %v1698_v0  ;;  %v967_v4 = vadd.f32 1e-06, %v951_v63  ;;  %v1021_v11 = vpack.c.bf16 %v1010_v2, %v1009_v31  ;;  %v1022_v18 = vpack.c.bf16 %v1012_v22, %v1011_v25  ;;  %v3153_v31 = vld [vmem:[%s3338_s3 + $0x148] sm:$0xff]  }
 0x31c   : > { %v965_v40 = vadd.f32 1e-06, %v949_v59  ;;  %v997_v6 = vmul.f32 %v981_v54, %v964_v52  ;;  %v999_v8 = vmul.f32 %v983_v47, %v966_v51 }
 0x31d   : > { %v1701_v12 = vsel %vm1685_vm1, %v967_v4, 0.0  ;;  %2129 = vmatprep.mubr.bf16.mxu1 %v1021_v11  ;;  %v1000_v3 = vmul.f32 %v984_v36, %v967_v4 }
 0x31e   : > { %v3101_v43 = vsel %vm1684_vm2, %v2895_v5, %v1701_v12  ;;  %v1699_v9 = vsel %vm1685_vm1, %v965_v40, 0.0  ;;  %v998_v13 = vmul.f32 %v982_v34, %v965_v40  ;;  %v1015_v15 = vsel %vm968_vm3, %v999_v8, %v2886_v58  ;;  %v2301_v58 = vld [vmem:[%s3338_s3 + $0x110] sm:$0xff]  }
 0x31f   : > { %v3108_v14 = vsel %vm1684_vm2, %v2905_v21, %v1699_v9  ;;  %v1016_v16 = vsel %vm968_vm3, %v1000_v3, %v2895_v5  ;;  %v1013_v7 = vsel %vm968_vm3, %v997_v6, %v2890_v62  ;;  %2149 = vmatprep.subr.bf16.mxu0 %v2301_v58  ;;  %v2302_v5 = vld [vmem:[%s3338_s3 + $0x118] sm:$0xff]   ;;  %v2303_v62 = vld [vmem:[%s3338_s3 + $0x120] sm:$0xff]  }
 0x320   : > { %2130 = vmatmul.mubr.bf16.gmra.mrb[24].mxu1 %v1022_v18  ;;  %v1014_v60 = vsel %vm968_vm3, %v998_v13, %v2905_v21  ;;  %v1024_v20 = vpack.c.bf16 %v1016_v16, %v1015_v15  ;;  %2150 = vmatpush3.bf16.msra.mxu0 %v2301_v58  ;;  %v2304_v21 = vld [vmem:[%s3338_s3 + $0x128] sm:$0xff]  }
 0x321   : > { %v1023_v23 = vpack.c.bf16 %v1014_v60, %v1013_v7  ;;  %2151 = vmatprep.subr.bf16.mxu0 %v2302_v5  ;;  %2201 = vmatprep.subr.bf16.mxu1 %v2303_v62 }
 0x322   : > { %2209 = vmatpush3.bf16.msra.mxu1 %v2303_v62 }
 0x323   : > { %2133 = vmatprep.mubr.bf16.mxu1 %v1023_v23  ;;  %2202 = vmatprep.subr.bf16.mxu1 %v2304_v21 }
 0x324   : > { %2152 = vmatpush3.bf16.msra.mxu0 %v2302_v5 }
 0x325   : > { %2169 = vmatprep.subr.bf16.mxu0 %v2303_v62 }
 0x326   : > { %2210 = vmatpush3.bf16.msra.mxu1 %v2304_v21 }
 0x327   : > { %2203 = vmatprep.subr.bf16.mxu1 %v2305_v24 }
 0x328   : > { %2134 = vmatmul.mubr.bf16.gmra.mrb[28].mxu1 %v1024_v20 }
 0x32a   : > { %2211 = vmatpush3.bf16.msra.mxu1 %v2305_v24 }
 0x32b   : > { %2204 = vmatprep.subr.bf16.mxu1 %v3140_v27 }
 0x32e   : > { %2212 = vmatpush3.bf16.msra.mxu1 %v3140_v27 }
 0x32f   : > { %2205 = vmatprep.subr.bf16.mxu1 %v3146_v30 }
 0x332   : > { %2213 = vmatpush3.bf16.msra.mxu1 %v3146_v30 }
 0x333   : > { %2206 = vmatprep.subr.bf16.mxu1 %v3153_v31 }
 0x336   : > { %2214 = vmatpush3.bf16.msra.mxu1 %v3153_v31 }
 0x3e3   : > { %v2123_v44 = vpop.f32.mrb[16].mxu1 }
 0x3e4   : > { %v1137_v38 = vadd.f32 %v2123_v44, %v3161_v33  ;;  %v1128_v39 = vpop.f32.mrb[17].mxu1 }
 0x3e5   : > { %v1129_v41 = vadd.f32 %v3161_v33, %v1128_v39  ;;  %v2124_v42 = vpop.f32.mrb[18].mxu1 }
 0x3e6   : > { %v1140_v51 = vadd.f32 %v2124_v42, %v3161_v33  ;;  %v1131_v49 = vpop.f32.mrb[19].mxu1  ;;  %v1193_v48 = vmax.f32 %v1137_v38, 0.0 }
 0x3e7   : > { %v1132_v25 = vadd.f32 %v3161_v33, %v1131_v49  ;;  %v1191_v53 = vmax.f32 %v1129_v41, 0.0 }
 0x3e8   : > { %v1194_v52 = vmax.f32 %v1140_v51, 0.0 }
 0x3e9   : > { %v1192_v55 = vmax.f32 %v1132_v25, 0.0 }
 0x3ea   : > { %v1208_v57 = vpack.c.bf16 %v1194_v52, %v1193_v48 }
 0x3eb   : > { %v1207_v63 = vpack.c.bf16 %v1192_v55, %v1191_v53  ;;  %v2127_v22 = vpop.f32.mrb[20].mxu1 }
 0x3ec   : > { %v1153_v54 = vadd.f32 %v2127_v22, %v3161_v33  ;;  %v1144_v47 = vpop.f32.mrb[21].mxu1 }
 0x3ed   : > { %v1145_v0 = vadd.f32 %v3161_v33, %v1144_v47  ;;  %v2128_v59 = vpop.f32.mrb[22].mxu1  ;;  %2153 = vmatprep.mubr.bf16.mxu0 %v1207_v63 }
 0x3ee   : > { %v1156_v2 = vadd.f32 %v2128_v59, %v3161_v33  ;;  %v1147_v36 = vpop.f32.mrb[23].mxu1  ;;  %2154 = vmatmul.mubr.bf16.vlgmr.msra.gmra.mrb[32].mxu0 %v1208_v57  ;;  %v1197_v11 = vmax.f32 %v1153_v54, 0.0  ;;  %v2309_v57 = vld [vmem:[%s3338_s3 + $0x150] sm:$0xff]  }
 0x3ef   : > { %v1148_v4 = vadd.f32 %v3161_v33, %v1147_v36  ;;  %2170 = vmatpush3.bf16.msra.mxu0 %v2303_v62  ;;  %v1195_v34 = vmax.f32 %v1145_v0, 0.0  ;;  %2207 = vmatprep.subr.bf16.mxu1 %v2309_v57 }
 0x3f0   : > { %v1198_v18 = vmax.f32 %v1156_v2, 0.0  ;;  %2171 = vmatprep.subr.bf16.mxu0 %v2304_v21  ;;  %2215 = vmatpush3.bf16.msra.mxu1 %v2309_v57 }
 0x3f1   : > { %v1196_v40 = vmax.f32 %v1148_v4, 0.0 }
 0x3f2   : > { %v1210_v6 = vpack.c.bf16 %v1198_v18, %v1197_v11 }
 0x3f3   : > { %v1209_v8 = vpack.c.bf16 %v1196_v40, %v1195_v34  ;;  %v2131_v12 = vpop.f32.mrb[24].mxu1  ;;  %2172 = vmatpush3.bf16.msra.mxu0 %v2304_v21 }
 0x3f4   : > { %v1169_v3 = vadd.f32 %v2131_v12, %v3161_v33  ;;  %v1160_v9 = vpop.f32.mrb[25].mxu1  ;;  %2173 = vmatprep.subr.bf16.mxu0 %v2305_v24 }
 0x3f5   : > { %v1161_v13 = vadd.f32 %v3161_v33, %v1160_v9  ;;  %v2132_v15 = vpop.f32.mrb[26].mxu1  ;;  %2157 = vmatprep.mubr.bf16.mxu0 %v1209_v8 }
 0x3f6   : > { %v1172_v16 = vadd.f32 %v2132_v15, %v3161_v33  ;;  %v1163_v7 = vpop.f32.mrb[27].mxu1  ;;  %2158 = vmatmul.mubr.bf16.gmra.mrb[36].mxu0 %v1210_v6  ;;  %v1201_v20 = vmax.f32 %v1169_v3, 0.0 }
 0x3f7   : > { %v1164_v60 = vadd.f32 %v3161_v33, %v1163_v7  ;;  %2174 = vmatpush3.bf16.msra.mxu0 %v2305_v24  ;;  %v1199_v58 = vmax.f32 %v1161_v13, 0.0 }
 0x3f8   : > { %v1202_v23 = vmax.f32 %v1172_v16, 0.0  ;;  %2175 = vmatprep.subr.bf16.mxu0 %v3140_v27 }
 0x3f9   : > { %v1200_v5 = vmax.f32 %v1164_v60, 0.0 }
 0x3fa   : > { %v1212_v62 = vpack.c.bf16 %v1202_v23, %v1201_v20 }
 0x3fb   : > { %v1211_v21 = vpack.c.bf16 %v1200_v5, %v1199_v58  ;;  %v2135_v44 = vpop.f32.mrb[28].mxu1  ;;  %2176 = vmatpush3.bf16.msra.mxu0 %v3140_v27 }
 0x3fc   : > { %v1185_v38 = vadd.f32 %v2135_v44, %v3161_v33  ;;  %v1176_v39 = vpop.f32.mrb[29].mxu1  ;;  %2177 = vmatprep.subr.bf16.mxu0 %v3146_v30 }
 0x3fd   : > { %v1177_v41 = vadd.f32 %v3161_v33, %v1176_v39  ;;  %v2136_v42 = vpop.f32.mrb[30].mxu1  ;;  %2161 = vmatprep.mubr.bf16.mxu0 %v1211_v21 }
 0x3fe   : > { %v1188_v24 = vadd.f32 %v2136_v42, %v3161_v33  ;;  %v1179_v51 = vpop.f32.mrb[31].mxu1  ;;  %2162 = vmatmul.mubr.bf16.gmra.mrb[40].mxu0 %v1212_v62  ;;  %v1205_v25 = vmax.f32 %v1185_v38, 0.0 }
 0x3ff   : > { %v1180_v49 = vadd.f32 %v3161_v33, %v1179_v51  ;;  %2178 = vmatpush3.bf16.msra.mxu0 %v3146_v30  ;;  %v1203_v27 = vmax.f32 %v1177_v41, 0.0  ;;  %v2310_v30 = vld [vmem:[%s3338_s3 + $0x158] sm:$0xff]  }
 0x400   : > { %v1206_v48 = vmax.f32 %v1188_v24, 0.0  ;;  %2179 = vmatprep.subr.bf16.mxu0 %v3153_v31  ;;  %2208 = vmatprep.subr.bf16.mxu1 %v2310_v30 }
 0x401   : > { %v1204_v52 = vmax.f32 %v1180_v49, 0.0  ;;  %2216 = vmatpush3.bf16.msra.mxu1 %v2310_v30 }
 0x402   : > { %v1214_v53 = vpack.c.bf16 %v1206_v48, %v1205_v25 }
 0x403   : > { %v1213_v55 = vpack.c.bf16 %v1204_v52, %v1203_v27  ;;  %2180 = vmatpush3.bf16.msra.mxu0 %v3153_v31  ;;  %v1900_v31 = vld [vmem:[%s3339_s4 + $0x4] ss:$0 sm:$0xff] }
 0x404   : > { %2181 = vmatprep.subr.bf16.mxu0 %v2309_v57 }
 0x405   : > { %2165 = vmatprep.mubr.bf16.mxu0 %v1213_v55 }
 0x406   : > { %2166 = vmatmul.mubr.bf16.gmra.mrb[44].mxu0 %v1214_v53 }
 0x407   : > { %2182 = vmatpush3.bf16.msra.mxu0 %v2309_v57 }
 0x408   : > { %2183 = vmatprep.subr.bf16.mxu0 %v2310_v30 }
 0x40b   : > { %2184 = vmatpush3.bf16.msra.mxu0 %v2310_v30 }
 0x4c1   : > { %v2155_v33 = vpop.f32.mrb[32].mxu0 }
 0x4c2   : > { %v1327_v63 = vadd.f32 %v2155_v33, %v1900_v31  ;;  %v1318_v22 = vpop.f32.mrb[33].mxu0 }
 0x4c3   : > { %v1319_v54 = vadd.f32 %v1900_v31, %v1318_v22  ;;  %v2156_v47 = vpop.f32.mrb[34].mxu0 }
 0x4c4   : > { %v1330_v0 = vadd.f32 %v2156_v47, %v1900_v31  ;;  %v1321_v59 = vpop.f32.mrb[35].mxu0  ;;  %v1383_v36 = vmax.f32 %v1327_v63, 0.0 }
 0x4c5   : > { %v1322_v2 = vadd.f32 %v1900_v31, %v1321_v59  ;;  %v1381_v11 = vmax.f32 %v1319_v54, 0.0 }
 0x4c6   : > { %v1384_v4 = vmax.f32 %v1330_v0, 0.0 }
 0x4c7   : > { %v1382_v18 = vmax.f32 %v1322_v2, 0.0 }
 0x4c8   : > { %v1398_v34 = vpack.c.bf16 %v1384_v4, %v1383_v36 }
 0x4c9   : > { %v1397_v40 = vpack.c.bf16 %v1382_v18, %v1381_v11  ;;  %v2159_v6 = vpop.f32.mrb[36].mxu0  ;;  %v3197_v11 = vld [vmem:[%s3339_s4 + $0x5] ss:$0 sm:$0xff] }
 0x4ca   : > { %v1343_v8 = vadd.f32 %v2159_v6, %v1900_v31  ;;  %v1334_v12 = vpop.f32.mrb[37].mxu0 }
 0x4cb   : > { %v1335_v3 = vadd.f32 %v1900_v31, %v1334_v12  ;;  %v2160_v9 = vpop.f32.mrb[38].mxu0  ;;  %2185 = vmatprep.mubr.bf16.mxu0 %v1397_v40 }
 0x4cc   : > { %v1346_v13 = vadd.f32 %v2160_v9, %v1900_v31  ;;  %v1337_v15 = vpop.f32.mrb[39].mxu0  ;;  %2186 = vmatmul.mubr.bf16.vlgmr.msra.gmra.mrb[48].mxu0 %v1398_v34  ;;  %v1387_v7 = vmax.f32 %v1343_v8, 0.0 }
 0x4cd   : > { %v1338_v16 = vadd.f32 %v1900_v31, %v1337_v15  ;;  %v1385_v20 = vmax.f32 %v1335_v3, 0.0 }
 0x4ce   : > { %v1388_v60 = vmax.f32 %v1346_v13, 0.0 }
 0x4cf   : > { %v1386_v23 = vmax.f32 %v1338_v16, 0.0 }
 0x4d0   : > { %v1400_v58 = vpack.c.bf16 %v1388_v60, %v1387_v7 }
 0x4d1   : > { %v1399_v5 = vpack.c.bf16 %v1386_v23, %v1385_v20  ;;  %v2163_v62 = vpop.f32.mrb[40].mxu0 }
 0x4d2   : > { %v1359_v21 = vadd.f32 %v2163_v62, %v1900_v31  ;;  %v1350_v44 = vpop.f32.mrb[41].mxu0 }
 0x4d3   : > { %v1351_v38 = vadd.f32 %v1900_v31, %v1350_v44  ;;  %v2164_v39 = vpop.f32.mrb[42].mxu0  ;;  %2189 = vmatprep.mubr.bf16.mxu1 %v1399_v5 }
 0x4d4   : > { %v1362_v41 = vadd.f32 %v2164_v39, %v1900_v31  ;;  %v1353_v42 = vpop.f32.mrb[43].mxu0  ;;  %2190 = vmatmul.mubr.bf16.vlgmr.msra.gmra.mrb[32].mxu1 %v1400_v58  ;;  %v1391_v51 = vmax.f32 %v1359_v21, 0.0 }
 0x4d5   : > { %v1354_v24 = vadd.f32 %v1900_v31, %v1353_v42  ;;  %v1389_v25 = vmax.f32 %v1351_v38, 0.0 }
 0x4d6   : > { %v1392_v49 = vmax.f32 %v1362_v41, 0.0 }
 0x4d7   : > { %v1390_v48 = vmax.f32 %v1354_v24, 0.0 }
 0x4d8   : > { %v1402_v27 = vpack.c.bf16 %v1392_v49, %v1391_v51 }
 0x4d9   : > { %v1401_v52 = vpack.c.bf16 %v1390_v48, %v1389_v25  ;;  %v2167_v53 = vpop.f32.mrb[44].mxu0 }
 0x4da   : > { %v1375_v55 = vadd.f32 %v2167_v53, %v1900_v31  ;;  %v1366_v57 = vpop.f32.mrb[45].mxu0 }
 0x4db   : > { %v1367_v30 = vadd.f32 %v1900_v31, %v1366_v57  ;;  %v2168_v33 = vpop.f32.mrb[46].mxu0  ;;  %2193 = vmatprep.mubr.bf16.mxu1 %v1401_v52 }
 0x4dc   : > { %v1378_v63 = vadd.f32 %v2168_v33, %v1900_v31  ;;  %v1369_v22 = vpop.f32.mrb[47].mxu0  ;;  %2194 = vmatmul.mubr.bf16.gmra.mrb[36].mxu1 %v1402_v27  ;;  %v1395_v47 = vmax.f32 %v1375_v55, 0.0 }
 0x4dd   : > { %v1370_v54 = vadd.f32 %v1900_v31, %v1369_v22  ;;  %v1393_v59 = vmax.f32 %v1367_v30, 0.0 }
 0x4de   : > { %v1396_v0 = vmax.f32 %v1378_v63, 0.0 }
 0x4df   : > { %v1394_v2 = vmax.f32 %v1370_v54, 0.0 }
 0x4e0   : > { %v1404_v36 = vpack.c.bf16 %v1396_v0, %v1395_v47 }
 0x4e1   : > { %v1403_v4 = vpack.c.bf16 %v1394_v2, %v1393_v59 }
 0x4e3   : > { %2197 = vmatprep.mubr.bf16.mxu1 %v1403_v4 }
 0x4e4   : > { %2198 = vmatmul.mubr.bf16.gmra.mrb[40].mxu1 %v1404_v36 }
 0x59f   : > { %v2187_v18 = vpop.f32.mrb[48].mxu0 }
 0x5a0   : > { %v1517_v34 = vadd.f32 %v2187_v18, %v3197_v11  ;;  %v1508_v40 = vpop.f32.mrb[49].mxu0 }
 0x5a1   : > { %v1509_v6 = vadd.f32 %v3197_v11, %v1508_v40  ;;  %v2188_v31 = vpop.f32.mrb[50].mxu0 }
 0x5a2   : > { %v1573_v8 = vsub.f32 0.0, %v1517_v34  ;;  %v1520_v12 = vadd.f32 %v2188_v31, %v3197_v11  ;;  %v1511_v3 = vpop.f32.mrb[51].mxu0 }
 0x5a3   : > { %v1571_v9 = vsub.f32 0.0, %v1509_v6  ;;  %v1512_v13 = vadd.f32 %v3197_v11, %v1511_v3 }
 0x5a4   : > { %v1591_v15 = vmul.f32 1.442695, %v1573_v8  ;;  %v1574_v16 = vsub.f32 0.0, %v1520_v12 }
 0x5a5   : > { %v1587_v7 = vmul.f32 1.442695, %v1571_v9  ;;  %v1572_v60 = vsub.f32 0.0, %v1512_v13 }
 0x5a6   : > { %2375 = vpow2.f32 %v1591_v15  ;;  %v1593_v20 = vmul.f32 1.442695, %v1574_v16 }
 0x5a7   : > { %2377 = vpow2.f32 %v1587_v7  ;;  %v1589_v23 = vmul.f32 1.442695, %v1572_v60  ;;  %v2191_v58 = vpop.f32.mrb[32].mxu1 }
 0x5a8   : > { %2379 = vpow2.f32 %v1593_v20  ;;  %v1533_v5 = vadd.f32 %v2191_v58, %v3197_v11  ;;  %v1524_v62 = vpop.f32.mrb[33].mxu1 }
 0x5a9   : > { %2381 = vpow2.f32 %v1589_v23  ;;  %v1525_v21 = vadd.f32 %v3197_v11, %v1524_v62  ;;  %v2192_v44 = vpop.f32.mrb[34].mxu1 }
 0x5aa   : > { %v1577_v38 = vsub.f32 0.0, %v1533_v5  ;;  %v1536_v39 = vadd.f32 %v2192_v44, %v3197_v11  ;;  %v1527_v41 = vpop.f32.mrb[35].mxu1 }
 0x5ab   : > { %v1575_v42 = vsub.f32 0.0, %v1525_v21  ;;  %v1528_v24 = vadd.f32 %v3197_v11, %v1527_v41 }
 0x5ac   : > { %v1599_v51 = vmul.f32 1.442695, %v1577_v38  ;;  %v1578_v49 = vsub.f32 0.0, %v1536_v39 }
 0x5ad   : > { %v1595_v25 = vmul.f32 1.442695, %v1575_v42  ;;  %v1576_v48 = vsub.f32 0.0, %v1528_v24 }
 0x5ae   : > { %2383 = vpow2.f32 %v1599_v51  ;;  %v1601_v27 = vmul.f32 1.442695, %v1578_v49 }
 0x5af   : > { %2385 = vpow2.f32 %v1595_v25  ;;  %v1597_v52 = vmul.f32 1.442695, %v1576_v48  ;;  %v2195_v53 = vpop.f32.mrb[36].mxu1 }
 0x5b0   : > { %v2376_v55 = vpop.eup %2375  ;;  %2387 = vpow2.f32 %v1601_v27  ;;  %v1549_v57 = vadd.f32 %v2195_v53, %v3197_v11  ;;  %v1540_v30 = vpop.f32.mrb[37].mxu1 }
 0x5b1   : > { %v2378_v33 = vpop.eup %2377  ;;  %v1621_v63 = vadd.f32 1.0, %v2376_v55  ;;  %2389 = vpow2.f32 %v1597_v52  ;;  %v1541_v22 = vadd.f32 %v3197_v11, %v1540_v30  ;;  %v2196_v54 = vpop.f32.mrb[38].mxu1 }
 0x5b2   : > { %v2380_v47 = vpop.eup %2379  ;;  %v1619_v0 = vadd.f32 1.0, %v2378_v33  ;;  %v1581_v59 = vsub.f32 0.0, %v1549_v57  ;;  %v1552_v2 = vadd.f32 %v2196_v54, %v3197_v11  ;;  %v1543_v36 = vpop.f32.mrb[39].mxu1 }
 0x5b3   : > { %v2382_v4 = vpop.eup %2381  ;;  %2391 = vrcp.f32 %v1621_v63  ;;  %v1622_v18 = vadd.f32 1.0, %v2380_v47  ;;  %v1579_v34 = vsub.f32 0.0, %v1541_v22  ;;  %v1544_v40 = vadd.f32 %v3197_v11, %v1543_v36 }
 0x5b4   : > { %2393 = vrcp.f32 %v1619_v0  ;;  %v1620_v6 = vadd.f32 1.0, %v2382_v4  ;;  %v1607_v31 = vmul.f32 1.442695, %v1581_v59  ;;  %v1582_v8 = vsub.f32 0.0, %v1552_v2 }
 0x5b5   : > { %2395 = vrcp.f32 %v1622_v18  ;;  %v1603_v12 = vmul.f32 1.442695, %v1579_v34  ;;  %v1580_v3 = vsub.f32 0.0, %v1544_v40 }
 0x5b6   : > { %2397 = vrcp.f32 %v1620_v6  ;;  %v1609_v9 = vmul.f32 1.442695, %v1582_v8 }
 0x5b7   : > { %2399 = vpow2.f32 %v1607_v31  ;;  %v1605_v13 = vmul.f32 1.442695, %v1580_v3  ;;  %v2199_v15 = vpop.f32.mrb[40].mxu1 }
 0x5b8   : > { %v2384_v16 = vpop.eup %2383  ;;  %2401 = vpow2.f32 %v1603_v12  ;;  %v1565_v7 = vadd.f32 %v2199_v15, %v3197_v11  ;;  %v1556_v60 = vpop.f32.mrb[41].mxu1 }
 0x5b9   : > { %v2386_v20 = vpop.eup %2385  ;;  %v1625_v23 = vadd.f32 1.0, %v2384_v16  ;;  %2403 = vpow2.f32 %v1609_v9  ;;  %v1557_v58 = vadd.f32 %v3197_v11, %v1556_v60  ;;  %v2200_v5 = vpop.f32.mrb[42].mxu1 }
 0x5ba   : > { %v2388_v62 = vpop.eup %2387  ;;  %v1623_v21 = vadd.f32 1.0, %v2386_v20  ;;  %2405 = vpow2.f32 %v1605_v13  ;;  %v1585_v44 = vsub.f32 0.0, %v1565_v7  ;;  %v1568_v38 = vadd.f32 %v2200_v5, %v3197_v11  ;;  %v1559_v39 = vpop.f32.mrb[43].mxu1 }
 0x5bb   : > { %v2390_v41 = vpop.eup %2389  ;;  %2407 = vrcp.f32 %v1625_v23  ;;  %v1626_v42 = vadd.f32 1.0, %v2388_v62  ;;  %v1583_v24 = vsub.f32 0.0, %v1557_v58  ;;  %v1560_v51 = vadd.f32 %v3197_v11, %v1559_v39 }
 0x5bc   : > { %2409 = vrcp.f32 %v1623_v21  ;;  %v1624_v49 = vadd.f32 1.0, %v2390_v41  ;;  %v1615_v25 = vmul.f32 1.442695, %v1585_v44  ;;  %v1586_v48 = vsub.f32 0.0, %v1568_v38 }
 0x5bd   : > { %v2392_v27 = vpop.eup %2391  ;;  %2411 = vrcp.f32 %v1626_v42  ;;  %v1611_v52 = vmul.f32 1.442695, %v1583_v24  ;;  %v1584_v53 = vsub.f32 0.0, %v1560_v51 }
 0x5be   : > { %v2394_v55 = vpop.eup %2393  ;;  %v1653_v57 = vmax.f32 %v2392_v27, 0.0  ;;  %2413 = vrcp.f32 %v1624_v49  ;;  %v1617_v30 = vmul.f32 1.442695, %v1586_v48 }
 0x5bf   : > { %v2396_v33 = vpop.eup %2395  ;;  %v1651_v63 = vmax.f32 %v2394_v55, 0.0  ;;  %2415 = vpow2.f32 %v1615_v25  ;;  %v1613_v22 = vmul.f32 1.442695, %v1584_v53 }
 0x5c0   : > { %v2398_v11 = vpop.eup %2397  ;;  %v1669_v54 = vmin.f32 %v1653_v57, 1.0  ;;  %v1654_v47 = vmax.f32 %v2396_v33, 0.0  ;;  %2417 = vpow2.f32 %v1611_v52 }
 0x5c1   : > { %v2400_v0 = vpop.eup %2399  ;;  %v1667_v59 = vmin.f32 %v1651_v63, 1.0  ;;  %v1652_v2 = vmax.f32 %v2398_v11, 0.0  ;;  %2419 = vpow2.f32 %v1617_v30 }
 0x5c2   : > { %v2402_v36 = vpop.eup %2401  ;;  %v1720_v4 = vsel %vm1683_vm4, %v1669_v54, %v2926_v56  ;;  %v1670_v18 = vmin.f32 %v1654_v47, 1.0  ;;  %v1629_v34 = vadd.f32 1.0, %v2400_v0  ;;  %2421 = vpow2.f32 %v1613_v22 }
 0x5c3   : > { %v2404_v40 = vpop.eup %2403  ;;  %1736 = vst [vmem:[%s3221_s27 + $0x10] sm:$0xff] %v1720_v4  ;;  %v1718_v6 = vsel %vm1683_vm4, %v1667_v59, %v2938_v19  ;;  %v1668_v31 = vmin.f32 %v1652_v2, 1.0  ;;  %v1627_v8 = vadd.f32 1.0, %v2402_v36 }
 0x5c4   : > { %v2406_v12 = vpop.eup %2405  ;;  %1734 = vst [vmem:[%s3221_s27] sm:$0xff] %v1718_v6  ;;  %v1721_v56 = vsel %vm1683_vm4, %v1670_v18, %v2945_v26  ;;  %2423 = vrcp.f32 %v1629_v34  ;;  %v1630_v3 = vadd.f32 1.0, %v2404_v40 }
 0x5c5   : > { %v2408_v9 = vpop.eup %2407  ;;  %1737 = vst [vmem:[%s3221_s27 + $0x18] sm:$0xff] %v1721_v56  ;;  %v1719_v13 = vsel %vm1683_vm4, %v1668_v31, %v2958_v37  ;;  %2425 = vrcp.f32 %v1627_v8  ;;  %v1628_v15 = vadd.f32 1.0, %v2406_v12 }
 0x5c6   : > { %v2410_v16 = vpop.eup %2409  ;;  %1735 = vst [vmem:[%s3221_s27 + $0x8] sm:$0xff] %v1719_v13  ;;  %v1657_v19 = vmax.f32 %v2408_v9, 0.0  ;;  %2427 = vrcp.f32 %v1630_v3 }
 0x5c7   : > { %v2412_v7 = vpop.eup %2411  ;;  %v1655_v60 = vmax.f32 %v2410_v16, 0.0  ;;  %2429 = vrcp.f32 %v1628_v15 }
 0x5c8   : > { %v2414_v20 = vpop.eup %2413  ;;  %v1673_v26 = vmin.f32 %v1657_v19, 1.0  ;;  %v1658_v23 = vmax.f32 %v2412_v7, 0.0 }
 0x5c9   : > { %v2416_v58 = vpop.eup %2415  ;;  %v1671_v5 = vmin.f32 %v1655_v60, 1.0  ;;  %v1656_v62 = vmax.f32 %v2414_v20, 0.0 }
 0x5ca   : > { %v2418_v21 = vpop.eup %2417  ;;  %v1724_v37 = vsel %vm1683_vm4, %v1673_v26, %v2978_v28  ;;  %v1674_v44 = vmin.f32 %v1658_v23, 1.0  ;;  %v1633_v38 = vadd.f32 1.0, %v2416_v58 }
 0x5cb   : > { %v2420_v39 = vpop.eup %2419  ;;  %1740 = vst [vmem:[%s3221_s27 + $0x30] sm:$0xff] %v1724_v37  ;;  %v1722_v41 = vsel %vm1683_vm4, %v1671_v5, %v2983_v50  ;;  %v1672_v42 = vmin.f32 %v1656_v62, 1.0  ;;  %v1631_v24 = vadd.f32 1.0, %v2418_v21 }
 0x5cc   : > { %v2422_v51 = vpop.eup %2421  ;;  %1738 = vst [vmem:[%s3221_s27 + $0x20] sm:$0xff] %v1722_v41  ;;  %v1725_v49 = vsel %vm1683_vm4, %v1674_v44, %v2991_v17  ;;  %2431 = vrcp.f32 %v1633_v38  ;;  %v1634_v25 = vadd.f32 1.0, %v2420_v39 }
 0x5cd   : > { %1741 = vst [vmem:[%s3221_s27 + $0x38] sm:$0xff] %v1725_v49  ;;  %v1723_v28 = vsel %vm1683_vm4, %v1672_v42, %v2999_v46  ;;  %2433 = vrcp.f32 %v1631_v24  ;;  %v1632_v48 = vadd.f32 1.0, %v2422_v51 }
 0x5ce   : > { %v2424_v27 = vpop.eup %2423  ;;  %1739 = vst [vmem:[%s3221_s27 + $0x28] sm:$0xff] %v1723_v28  ;;  %2435 = vrcp.f32 %v1634_v25 }
 0x5cf   : > { %v2426_v50 = vpop.eup %2425  ;;  %v1661_v52 = vmax.f32 %v2424_v27, 0.0  ;;  %2437 = vrcp.f32 %v1632_v48 }
 0x5d0   : > { %v2428_v53 = vpop.eup %2427  ;;  %v1659_v17 = vmax.f32 %v2426_v50, 0.0 }
 0x5d1   : > { %v2430_v55 = vpop.eup %2429  ;;  %v1677_v57 = vmin.f32 %v1661_v52, 1.0  ;;  %v1662_v30 = vmax.f32 %v2428_v53, 0.0 }
 0x5d2   : > { %v1675_v33 = vmin.f32 %v1659_v17, 1.0  ;;  %v1660_v63 = vmax.f32 %v2430_v55, 0.0 }
 0x5d3   : > { %v1728_v46 = vsel %vm1683_vm4, %v1677_v57, %v3034_v10  ;;  %v1678_v22 = vmin.f32 %v1662_v30, 1.0 }
 0x5d4   : > { %1744 = vst [vmem:[%s3221_s27 + $0x50] sm:$0xff] %v1728_v46  ;;  %v1726_v11 = vsel %vm1683_vm4, %v1675_v33, %v3044_v1  ;;  %v1676_v54 = vmin.f32 %v1660_v63, 1.0 }
 0x5d5   : > { %1742 = vst [vmem:[%s3221_s27 + $0x40] sm:$0xff] %v1726_v11  ;;  %v1729_v47 = vsel %vm1683_vm4, %v1678_v22, %v3060_v45 }
 0x5d6   : > { %v2432_v0 = vpop.eup %2431  ;;  %1745 = vst [vmem:[%s3221_s27 + $0x58] sm:$0xff] %v1729_v47  ;;  %v1727_v10 = vsel %vm1683_vm4, %v1676_v54, %v3070_v35 }
 0x5d7   : > { %v2434_v59 = vpop.eup %2433  ;;  %1743 = vst [vmem:[%s3221_s27 + $0x48] sm:$0xff] %v1727_v10  ;;  %v1665_v2 = vmax.f32 %v2432_v0, 0.0 }
 0x5d8   : > { %v2436_v36 = vpop.eup %2435  ;;  %v1663_v1 = vmax.f32 %v2434_v59, 0.0 }
 0x5d9   : > { %v2438_v4 = vpop.eup %2437  ;;  %v1681_v18 = vmin.f32 %v1665_v2, 1.0  ;;  %v1666_v34 = vmax.f32 %v2436_v36, 0.0 }
 0x5da   : > { %v1679_v45 = vmin.f32 %v1663_v1, 1.0  ;;  %v1664_v40 = vmax.f32 %v2438_v4, 0.0 }
 0x5db   : > { %v1732_v35 = vsel %vm1683_vm4, %v1681_v18, %v3082_v61  ;;  %v1682_v6 = vmin.f32 %v1666_v34, 1.0 }
 0x5dc   : > { %1748 = vst [vmem:[%s3221_s27 + $0x70] sm:$0xff] %v1732_v35  ;;  %v1730_v31 = vsel %vm1683_vm4, %v1679_v45, %v3093_v29  ;;  %v1680_v8 = vmin.f32 %v1664_v40, 1.0 }
 0x5dd   : > { %1746 = vst [vmem:[%s3221_s27 + $0x60] sm:$0xff] %v1730_v31  ;;  %v1733_v61 = vsel %vm1683_vm4, %v1682_v6, %v3101_v43 }
 0x5de   : > { %1749 = vst [vmem:[%s3221_s27 + $0x78] sm:$0xff] %v1733_v61  ;;  %v1731_v29 = vsel %vm1683_vm4, %v1680_v8, %v3108_v14 }
 0x5df   : > { %1747 = vst [vmem:[%s3221_s27 + $0x68] sm:$0xff] %v1731_v29 }
 0x5e0   : > { %2482 = shalt.err (!%p2479_p4)
}
 0x5e1   : > { %s2483_s11 = scalar_lea.hbm %s3280_s21, 2048  ;;  %s2487_s14 = scalar_lea.hbm %s3340_s5, 4096 }
 0x5e2   : > { %p2484_p5 = scmp.ne.s32.totalorder %s3280_s21, %s2483_s11  ;;  %p2488_p1 = scmp.lt.u32.totalorder %s3280_s21, %s3340_s5 }
 0x5e3   : > { %p2489_p3 = scmp.lt.u32.totalorder %s2487_s14, %s2483_s11  ;;  %p2491_p6 = scmp.lt.u32.totalorder %s2483_s11, %s3280_s21 }
 0x5e4   : > { %p2485_p7 = pnand %p2484_p5, %p3347_p12 }
 0x5e5   : > { %p2490_p11 = por %p2489_p3, %p2488_p1 }
 0x5e6   : > { %p2486_p9 = pneg %p2485_p7 }
 0x5e7   : > { %p2492_p13 = por %p2491_p6, %p2490_p11 }
 0x5e9   : > { %p2493_p8 = pnand %p2492_p13, %p2486_p9 }
 0x5eb   : > { %2496 = shalt.err (!%p2493_p8)
}
 0x5ec   : > { %s2541_s27 = smov 128   ;;  %s2542_s17 = smov 8  }
 0x5ed   : > { %2219 = dma.vmem_to_hbm [thread:$0]  (%p3347_p12), %s3282_s6, 2048, %s3280_s21, %s1751_s24, %s2541_s27, %s2541_s27, %s2542_s17  }
 0x5ee PF: > { %s1779_s7 = sand.u32 1, %s2523_s0   ;;  %p3348_p10 = scmp.ne.s32.totalorder %s3345_s30, 0 }
 0x5ef   : > { %p3349_p0 = scmp.ge.s32.totalorder %s2535_s20, 2  ;;  %s1780_s28 = scalar_lea.sflag [#allocation6], %s1779_s7 }
 0x5f1   : > { %p2226_p2 = pnand %p3349_p0, %p3348_p10 }
 0x5f3   : > { %2518 = dma.done.wait (!%p2226_p2), %s1780_s28, 2048  }
 0x5f4   : > { %2520 = vsyncadd (!%p2226_p2), %s1780_s28, 4294965248  ;;  %p19_p4 = scmp.ge.s32.totalorder %s2598_s23, 4   ;;  %s3350_s0 = smov %s2527_s18 }
 0x5f5   : > { %s3351_s18 = smov %s2531_s19  ;;  %s3352_s19 = smov %s2610_s26 }
 0x5f6   : > { %s3353_s20 = smov %s2598_s23  ;;  %21 = sbr.rel (!%p19_p4) target bundleno = 5 (0x5), region = 84 }
 0x5fd   :  { %1785 = vsyncpa [#allocation5], 1 }
 0x5fe   :  { %1787 = vsyncpa [#allocation5 + $0x1], 1 }
 0x5ff   :  { %1788 = vsyncpa [#allocation6], 1 }
 0x600   :  { %1790 = vsyncpa [#allocation6 + $0x1], 1 }

</bundles_post_ra>
